<compile_context>
chip_gen: v6e
topology: v6e:2x2x1
jax: 0.10.0
libtpu: 0.0.40
codegen_flags: <defaults>
</compile_context>

<pallas_src>
import functools

import jax
import jax.numpy as jnp
from jax.experimental import pallas as pl
from jax.experimental.pallas import tpu as pltpu

LANE = 128
SUBLANE = 8


def _round_up(n, m):
    return ((n + m - 1) // m) * m


# --------------------------------------------------------------------------
# Kernel
# --------------------------------------------------------------------------
def _cvae_kernel(
    xc_ref, eps_ref,
    w12_ref, b12_ref,        # fused [W1 | W2c], [b1 | b2]
    wms_ref, bms_ref,        # fused [Wmu | Wsigma], [bmu | bsigma]
    w2z_ref, w3_ref, b3_ref,
    xrec_ref, musig_ref,
):
    xc = xc_ref[...]                                         # (bb, K_PAD) bf16

    # ---- one MXU pass over xc: encoder hidden + decoder class path --------
    xw = jnp.dot(xc, w12_ref[...],
                 preferred_element_type=jnp.float32) + b12_ref[...]
    h_pad = xw.shape[1] // 2                                  # 128-aligned split
    h = jnp.maximum(xw[:, :h_pad], 0.0)                       # relu([x|c] @ W1 + b1)
    dec_c = xw[:, h_pad:]                                     # [x|c] @ W2c + b2

    # ---- fused mu|sigma head (single 128-lane slab) ------------------------
    musig = jnp.dot(h.astype(wms_ref.dtype), wms_ref[...],
                    preferred_element_type=jnp.float32) + bms_ref[...]
    musig_ref[...] = musig.astype(musig_ref.dtype)            # lane-dense packed out

    zs = musig.shape[1] // 2
    mu = musig[:, :zs]
    sigma = musig[:, zs:]

    # ---- reparametrize: z = mu + sigma * eps,  eps ~ U[0,1) ----------------
    z = mu + sigma * eps_ref[...]

    # ---- decoder: sigmoid(relu(z @ W2z + dec_c) @ W3 + b3) -----------------
    h2 = jnp.maximum(
        jnp.dot(z.astype(w2z_ref.dtype), w2z_ref[...],
                preferred_element_type=jnp.float32) + dec_c, 0.0)
    logits = jnp.dot(h2.astype(w3_ref.dtype), w3_ref[...],
                     preferred_element_type=jnp.float32) + b3_ref[...]
    # exact sigmoid via a single EUP tanh push
    xrec_ref[...] = (0.5 * jnp.tanh(0.5 * logits) + 0.5).astype(xrec_ref.dtype)


# --------------------------------------------------------------------------
# Parameters (PyTorch-style init) + packing into padded/fused kernel layout
# --------------------------------------------------------------------------
def init_params(key, feature_dim, class_dim, hidden_dim=200, z_dim=20):
    """Deterministic PyTorch-style (uniform +-1/sqrt(fan_in)) initialization."""
    def linear(k, fan_in, fan_out):
        kw, kb = jax.random.split(k)
        bound = 1.0 / jnp.sqrt(jnp.float32(fan_in))
        w = jax.random.uniform(kw, (fan_in, fan_out), jnp.float32, -bound, bound)
        b = jax.random.uniform(kb, (fan_out,), jnp.float32, -bound, bound)
        return w, b

    k1, k2, k3, k4, k5 = jax.random.split(key, 5)
    w1, b1 = linear(k1, feature_dim + class_dim, hidden_dim)   # image_2hid
    wmu, bmu = linear(k2, hidden_dim, z_dim)                   # hid_2mu
    wsig, bsig = linear(k3, hidden_dim, z_dim)                 # hid_2sigma
    w2, b2 = linear(k4, z_dim + class_dim, hidden_dim)         # z_2hid
    w3, b3 = linear(k5, hidden_dim, feature_dim)               # hid_2img
    return dict(w1=w1, b1=b1, wmu=wmu, bmu=bmu, wsig=wsig, bsig=bsig,
                w2=w2, b2=b2, w3=w3, b3=b3)


def pack_params(params, feature_dim, class_dim, hidden_dim, z_dim):
    """Zero-pad to lane multiples, fuse [W1|W2c] and [Wmu|Wsig], cast to bf16."""
    K_PAD = _round_up(feature_dim + class_dim, LANE)
    H_PAD = _round_up(hidden_dim, LANE)
    F_PAD = _round_up(feature_dim, LANE)
    ZS = _round_up(z_dim, 64)              # half-slab; 2*ZS is a lane multiple
    assert (2 * ZS) % LANE == 0
    bf = jnp.bfloat16

    # fused encoder / decoder-class-path weight: [W1 | W2c]  (K_PAD, 2*H_PAD)
    w12 = jnp.zeros((K_PAD, 2 * H_PAD), jnp.float32)
    w12 = w12.at[:feature_dim + class_dim, :hidden_dim].set(params["w1"])
    w12 = w12.at[feature_dim:feature_dim + class_dim,
                 H_PAD:H_PAD + hidden_dim].set(params["w2"][z_dim:])
    w12 = w12.astype(bf)
    b12 = jnp.zeros((1, 2 * H_PAD), jnp.float32)
    b12 = b12.at[0, :hidden_dim].set(params["b1"])
    b12 = b12.at[0, H_PAD:H_PAD + hidden_dim].set(params["b2"])

    # fused mu|sigma head, packed into a single 2*ZS (=128) lane slab
    wms = jnp.zeros((H_PAD, 2 * ZS), jnp.float32)
    wms = wms.at[:hidden_dim, :z_dim].set(params["wmu"])
    wms = wms.at[:hidden_dim, ZS:ZS + z_dim].set(params["wsig"])
    wms = wms.astype(bf)
    bms = jnp.zeros((1, 2 * ZS), jnp.float32)
    bms = bms.at[0, :z_dim].set(params["bmu"])
    bms = bms.at[0, ZS:ZS + z_dim].set(params["bsig"])

    # decoder z path
    w2z = jnp.zeros((ZS, H_PAD), jnp.float32)
    w2z = w2z.at[:z_dim, :hidden_dim].set(params["w2"][:z_dim]).astype(bf)

    w3 = jnp.zeros((H_PAD, F_PAD), jnp.float32)
    w3 = w3.at[:hidden_dim, :feature_dim].set(params["w3"]).astype(bf)
    b3 = jnp.zeros((1, F_PAD), jnp.float32).at[0, :feature_dim].set(params["b3"])

    return dict(w12=w12, b12=b12, wms=wms, bms=bms, w2z=w2z, w3=w3, b3=b3)


# --------------------------------------------------------------------------
# Wrapper
# --------------------------------------------------------------------------
@functools.partial(
    jax.jit,
    static_argnames=("feature_dim", "class_dim", "hidden_dim", "z_dim", "block_b"),
)
def cvae_forward(x, c, eps, packed, *, feature_dim, class_dim, hidden_dim,
                 z_dim, block_b=128):
    B = x.shape[0]
    K_PAD = _round_up(feature_dim + class_dim, LANE)
    H_PAD = _round_up(hidden_dim, LANE)
    F_PAD = _round_up(feature_dim, LANE)
    ZS = _round_up(z_dim, 64)

    # Pick the batch tile: large enough to fill the MXU (128-256 rows), but if
    # the batch is small, split it so there are >=2 grid steps and both v7x
    # TensorCores get work.  Always a sublane multiple.
    bb = min(block_b, 256)
    bb = max(SUBLANE, (bb // SUBLANE) * SUBLANE)
    if _round_up(B, bb) // bb < 2:
        bb = max(SUBLANE, _round_up(pl.cdiv(B, 2), SUBLANE))
    B_PAD = _round_up(B, bb)
    grid = (B_PAD // bb,)

    # Lane-dense packed [x | c] input (concat done once in the wrapper), bf16.
    xc = jnp.zeros((B_PAD, K_PAD), jnp.float32)
    xc = xc.at[:B, :feature_dim].set(x)
    xc = xc.at[:B, feature_dim:feature_dim + class_dim].set(c)
    xc = xc.astype(jnp.bfloat16)
    eps_p = jnp.zeros((B_PAD, ZS), jnp.float32).at[:B, :z_dim].set(eps)

    act = lambda i: (i, 0)   # batch-tiled activations / outputs
    pin = lambda i: (0, 0)   # weights stay resident in VMEM

    in_specs = [
        pl.BlockSpec((bb, K_PAD), act),            # xc
        pl.BlockSpec((bb, ZS), act),               # eps
        pl.BlockSpec((K_PAD, 2 * H_PAD), pin),     # w12  = [W1 | W2c]
        pl.BlockSpec((1, 2 * H_PAD), pin),         # b12  = [b1 | b2]
        pl.BlockSpec((H_PAD, 2 * ZS), pin),        # wms  = [Wmu | Wsig]
        pl.BlockSpec((1, 2 * ZS), pin),            # bms
        pl.BlockSpec((ZS, H_PAD), pin),            # w2z
        pl.BlockSpec((H_PAD, F_PAD), pin),         # w3
        pl.BlockSpec((1, F_PAD), pin),             # b3
    ]
    out_specs = (
        pl.BlockSpec((bb, F_PAD), act),            # x_recons (bf16, padded)
        pl.BlockSpec((bb, 2 * ZS), act),           # packed [mu | sigma] (f32)
    )
    out_shapes = (
        jax.ShapeDtypeStruct((B_PAD, F_PAD), jnp.bfloat16),
        jax.ShapeDtypeStruct((B_PAD, 2 * ZS), jnp.float32),
    )

    # Advisory cost + explicit VMEM budget (v5e default scoped VMEM is 16 MiB).
    weight_bytes = sum(int(v.size) * (2 if v.dtype == jnp.bfloat16 else 4)
                       for v in packed.values())
    block_io_bytes = bb * (K_PAD * 2 + ZS * 4 + F_PAD * 2 + 2 * ZS * 4)
    scratch_bytes = 6 * bb * 2 * H_PAD * 4        # f32 intermediates / spills
    need = 2 * block_io_bytes + weight_bytes + scratch_bytes + (2 << 20)
    vmem_limit = int(min(max(need, 32 << 20), 48 << 20))

    flops = 2 * B_PAD * (K_PAD * 2 * H_PAD       # fused encoder + class path
                         + H_PAD * 2 * ZS        # mu|sigma head
                         + ZS * H_PAD            # decoder z path
                         + H_PAD * F_PAD)        # hid -> img
    bytes_accessed = (xc.size * 2 + eps_p.size * 4 + weight_bytes
                      + B_PAD * F_PAD * 2 + B_PAD * 2 * ZS * 4)
    cost = pl.CostEstimate(flops=int(flops),
                           transcendentals=int(B_PAD * F_PAD),
                           bytes_accessed=int(bytes_accessed))

    xrec_p, musig_p = pl.pallas_call(
        _cvae_kernel,
        out_shape=out_shapes,
        grid_spec=pltpu.PrefetchScalarGridSpec(
            num_scalar_prefetch=0,
            grid=grid,
            in_specs=in_specs,
            out_specs=out_specs,
        ),
        compiler_params=pltpu.CompilerParams(
            dimension_semantics=("parallel",),
            vmem_limit_bytes=vmem_limit),
        cost_estimate=cost,
    )(xc, eps_p,
      packed["w12"], packed["b12"],
      packed["wms"], packed["bms"],
      packed["w2z"], packed["w3"], packed["b3"])

    x_recons = xrec_p[:B, :feature_dim].astype(jnp.float32)
    mu = musig_p[:B, :z_dim]
    sigma = musig_p[:B, ZS:ZS + z_dim]
    return x_recons, mu, sigma


# --------------------------------------------------------------------------
# References
# --------------------------------------------------------------------------
def cvae_reference(x, c, eps, params):
    """Pure-JAX f32 reference faithful to the PyTorch forward."""
    xc = jnp.concatenate([x, c], axis=1)
    h = jnp.maximum(xc @ params["w1"] + params["b1"], 0.0)
    mu = h @ params["wmu"] + params["bmu"]
    sigma = h @ params["wsig"] + params["bsig"]
    z = mu + sigma * eps
    zc = jnp.concatenate([z, c], axis=1)
    h2 = jnp.maximum(zc @ params["w2"] + params["b2"], 0.0)
    x_recons = jax.nn.sigmoid(h2 @ params["w3"] + params["b3"])
    return x_recons, mu, sigma


def cvae_reference_bf16(x, c, eps, params, z_dim):
    """Mirrors the kernel's numerics: bf16 matmul operands, f32 accumulation."""
    bf, f32 = jnp.bfloat16, jnp.float32
    xc = jnp.concatenate([x, c], axis=1).astype(bf)
    h = jnp.maximum(
        jnp.dot(xc, params["w1"].astype(bf), preferred_element_type=f32) + params["b1"], 0.0)
    hb = h.astype(bf)
    mu = jnp.dot(hb, params["wmu"].astype(bf), preferred_element_type=f32) + params["bmu"]
    sigma = jnp.dot(hb, params["wsig"].astype(bf), preferred_element_type=f32) + params["bsig"]
    z = mu + sigma * eps
    w2 = params["w2"].astype(bf)
    h2 = jnp.maximum(
        jnp.dot(z.astype(bf), w2[:z_dim], preferred_element_type=f32)
        + jnp.dot(c.astype(bf), w2[z_dim:], preferred_element_type=f32)
        + params["b2"], 0.0)
    logits = jnp.dot(h2.astype(bf), params["w3"].astype(bf),
                     preferred_element_type=f32) + params["b3"]
    return jax.nn.sigmoid(logits), mu, sigma


# --------------------------------------------------------------------------
if __name__ == "__main__":
    # Small shapes consistent with the module's forward.  Non-lane-aligned dims
    # on purpose to exercise the padding path; batch = 2 blocks of 128 so the
    # grid has >=2 parallel steps.
    batch = 256
    feature_dim = 64
    class_dim = 10
    hidden_dim = 200          # module default
    z_dim = 20                # module default
    block_b = 128

    key = jax.random.PRNGKey(0)
    kx, kc, keps, kp = jax.random.split(key, 4)

    x = jax.random.uniform(kx, (batch, feature_dim), jnp.float32)
    c_idx = jax.random.randint(kc, (batch,), 0, class_dim)
    c = jax.nn.one_hot(c_idx, class_dim, dtype=jnp.float32)
    eps = jax.random.uniform(keps, (batch, z_dim), jnp.float32)  # torch.rand_like

    params = init_params(kp, feature_dim, class_dim, hidden_dim, z_dim)
    packed = pack_params(params, feature_dim, class_dim, hidden_dim, z_dim)

    x_recons, mu, sigma = cvae_forward(
        x, c, eps, packed,
        feature_dim=feature_dim, class_dim=class_dim,
        hidden_dim=hidden_dim, z_dim=z_dim, block_b=block_b)
    jax.block_until_ready((x_recons, mu, sigma))

    assert x_recons.shape == (batch, feature_dim)
    assert mu.shape == (batch, z_dim) and sigma.shape == (batch, z_dim)

    # Faithful f32 reference (bf16 matmuls + bf16 x_recons => modest tol).
    xr_f32, mu_f32, sig_f32 = cvae_reference(x, c, eps, params)
    assert jnp.allclose(x_recons, xr_f32, atol=5e-2, rtol=5e-2)
    assert jnp.allclose(mu, mu_f32, atol=5e-2, rtol=5e-2)
    assert jnp.allclose(sigma, sig_f32, atol=5e-2, rtol=5e-2)

    # Numerics-matched bf16 reference (tight check of kernel plumbing).
    xr_bf, mu_bf, sig_bf = cvae_reference_bf16(x, c, eps, params, z_dim)
    assert jnp.allclose(mu, mu_bf, atol=2e-3, rtol=2e-3)
    assert jnp.allclose(sigma, sig_bf, atol=2e-3, rtol=2e-3)
    assert jnp.allclose(x_recons, xr_bf, atol=1e-2, rtol=1e-2)

    print("KERNEL_OK")
</pallas_src>

<mosaic_0001>
module attributes {stable_mosaic.version = 11 : i64} {
  func.func @_cvae_kernel(%arg0: i32, %arg1: memref<128x128xbf16, #tpu.memory_space<vmem>>, %arg2: memref<128x64xf32, #tpu.memory_space<vmem>>, %arg3: memref<128x512xbf16, #tpu.memory_space<vmem>>, %arg4: memref<1x512xf32, #tpu.memory_space<vmem>>, %arg5: memref<256x128xbf16, #tpu.memory_space<vmem>>, %arg6: memref<1x128xf32, #tpu.memory_space<vmem>>, %arg7: memref<64x256xbf16, #tpu.memory_space<vmem>>, %arg8: memref<256x128xbf16, #tpu.memory_space<vmem>>, %arg9: memref<1x128xf32, #tpu.memory_space<vmem>>, %arg10: memref<128x128xbf16, #tpu.memory_space<vmem>>, %arg11: memref<128x128xf32, #tpu.memory_space<vmem>>) attributes {dimension_semantics = [#tpu.dimension_semantics<parallel>], iteration_bounds = array<i64: 2>, scalar_prefetch = 0 : i64, scratch_operands = 0 : i64, tpu.core_type = #tpu.core_type<tc>, window_params = [{transform_indices = @transform_0, window_bounds = array<i64: 128, 128>}, {transform_indices = @transform_1, window_bounds = array<i64: 128, 64>}, {pipeline_mode = #tpu.pipeline_mode<synchronous>, transform_indices = @transform_2, window_bounds = array<i64: 128, 512>}, {pipeline_mode = #tpu.pipeline_mode<synchronous>, transform_indices = @transform_3, window_bounds = array<i64: 1, 512>}, {pipeline_mode = #tpu.pipeline_mode<synchronous>, transform_indices = @transform_4, window_bounds = array<i64: 256, 128>}, {pipeline_mode = #tpu.pipeline_mode<synchronous>, transform_indices = @transform_5, window_bounds = array<i64: 1, 128>}, {pipeline_mode = #tpu.pipeline_mode<synchronous>, transform_indices = @transform_6, window_bounds = array<i64: 64, 256>}, {pipeline_mode = #tpu.pipeline_mode<synchronous>, transform_indices = @transform_7, window_bounds = array<i64: 256, 128>}, {pipeline_mode = #tpu.pipeline_mode<synchronous>, transform_indices = @transform_8, window_bounds = array<i64: 1, 128>}, {transform_indices = @transform_9, window_bounds = array<i64: 128, 128>}, {transform_indices = @transform_10, window_bounds = array<i64: 128, 128>}]} {
    %c0 = arith.constant 0 : index
    %c0_0 = arith.constant 0 : index
    %0 = vector.load %arg1[%c0, %c0_0] : memref<128x128xbf16, #tpu.memory_space<vmem>>, vector<128x128xbf16>
    %c0_1 = arith.constant 0 : index
    %c0_2 = arith.constant 0 : index
    %1 = vector.load %arg3[%c0_1, %c0_2] : memref<128x512xbf16, #tpu.memory_space<vmem>>, vector<128x512xbf16>
    %cst = arith.constant dense<0.000000e+00> : vector<128x512xf32>
    %2 = tpu.matmul %0, %1, %cst {dimension_numbers = #tpu.dot_dimension_numbers<[1], [0], [0], [1], [0, 0, 1, 1], [], []>} : vector<128x128xbf16>, vector<128x512xbf16>, vector<128x512xf32> -> vector<128x512xf32>
    %c0_3 = arith.constant 0 : index
    %c0_4 = arith.constant 0 : index
    %3 = vector.load %arg4[%c0_3, %c0_4] : memref<1x512xf32, #tpu.memory_space<vmem>>, vector<1x512xf32>
    %4 = vector.broadcast %3 : vector<1x512xf32> to vector<128x512xf32>
    %5 = arith.addf %2, %4 : vector<128x512xf32>
    %6 = vector.extract_strided_slice %5 {offsets = [0, 0], sizes = [128, 256], strides = [1, 1]} : vector<128x512xf32> to vector<128x256xf32>
    %cst_5 = arith.constant 0.000000e+00 : f32
    %7 = vector.broadcast %cst_5 : f32 to vector<128x256xf32>
    %8 = arith.maximumf %6, %7 : vector<128x256xf32>
    %9 = vector.extract_strided_slice %5 {offsets = [0, 256], sizes = [128, 256], strides = [1, 1]} : vector<128x512xf32> to vector<128x256xf32>
    %10 = arith.truncf %8 : vector<128x256xf32> to vector<128x256xbf16>
    %c0_6 = arith.constant 0 : index
    %c0_7 = arith.constant 0 : index
    %11 = vector.load %arg5[%c0_6, %c0_7] : memref<256x128xbf16, #tpu.memory_space<vmem>>, vector<256x128xbf16>
    %cst_8 = arith.constant dense<0.000000e+00> : vector<128x128xf32>
    %12 = tpu.matmul %10, %11, %cst_8 {dimension_numbers = #tpu.dot_dimension_numbers<[1], [0], [0], [1], [0, 0, 1, 1], [], []>} : vector<128x256xbf16>, vector<256x128xbf16>, vector<128x128xf32> -> vector<128x128xf32>
    %c0_9 = arith.constant 0 : index
    %c0_10 = arith.constant 0 : index
    %13 = vector.load %arg6[%c0_9, %c0_10] : memref<1x128xf32, #tpu.memory_space<vmem>>, vector<1x128xf32>
    %14 = vector.broadcast %13 : vector<1x128xf32> to vector<128x128xf32>
    %15 = arith.addf %12, %14 : vector<128x128xf32>
    %c0_11 = arith.constant 0 : index
    %c0_12 = arith.constant 0 : index
    %16 = vector.load %arg11[%c0_11, %c0_12] : memref<128x128xf32, #tpu.memory_space<vmem>>, vector<128x128xf32>
    tpu.vector_store %arg11[%c0_11, %c0_12], %15 {strides = array<i32>} : memref<128x128xf32, #tpu.memory_space<vmem>>, vector<128x128xf32>,
    %17 = vector.extract_strided_slice %15 {offsets = [0, 0], sizes = [128, 64], strides = [1, 1]} : vector<128x128xf32> to vector<128x64xf32>
    %18 = vector.extract_strided_slice %15 {offsets = [0, 64], sizes = [128, 64], strides = [1, 1]} : vector<128x128xf32> to vector<128x64xf32>
    %c0_13 = arith.constant 0 : index
    %c0_14 = arith.constant 0 : index
    %19 = vector.load %arg2[%c0_13, %c0_14] : memref<128x64xf32, #tpu.memory_space<vmem>>, vector<128x64xf32>
    %20 = arith.mulf %18, %19 : vector<128x64xf32>
    %21 = arith.addf %17, %20 : vector<128x64xf32>
    %22 = arith.truncf %21 : vector<128x64xf32> to vector<128x64xbf16>
    %c0_15 = arith.constant 0 : index
    %c0_16 = arith.constant 0 : index
    %23 = vector.load %arg7[%c0_15, %c0_16] : memref<64x256xbf16, #tpu.memory_space<vmem>>, vector<64x256xbf16>
    %cst_17 = arith.constant dense<0.000000e+00> : vector<128x256xf32>
    %24 = tpu.matmul %22, %23, %cst_17 {dimension_numbers = #tpu.dot_dimension_numbers<[1], [0], [0], [1], [0, 0, 1, 1], [], []>} : vector<128x64xbf16>, vector<64x256xbf16>, vector<128x256xf32> -> vector<128x256xf32>
    %25 = arith.addf %24, %9 : vector<128x256xf32>
    %cst_18 = arith.constant 0.000000e+00 : f32
    %26 = vector.broadcast %cst_18 : f32 to vector<128x256xf32>
    %27 = arith.maximumf %25, %26 : vector<128x256xf32>
    %28 = arith.truncf %27 : vector<128x256xf32> to vector<128x256xbf16>
    %c0_19 = arith.constant 0 : index
    %c0_20 = arith.constant 0 : index
    %29 = vector.load %arg8[%c0_19, %c0_20] : memref<256x128xbf16, #tpu.memory_space<vmem>>, vector<256x128xbf16>
    %cst_21 = arith.constant dense<0.000000e+00> : vector<128x128xf32>
    %30 = tpu.matmul %28, %29, %cst_21 {dimension_numbers = #tpu.dot_dimension_numbers<[1], [0], [0], [1], [0, 0, 1, 1], [], []>} : vector<128x256xbf16>, vector<256x128xbf16>, vector<128x128xf32> -> vector<128x128xf32>
    %c0_22 = arith.constant 0 : index
    %c0_23 = arith.constant 0 : index
    %31 = vector.load %arg9[%c0_22, %c0_23] : memref<1x128xf32, #tpu.memory_space<vmem>>, vector<1x128xf32>
    %32 = vector.broadcast %31 : vector<1x128xf32> to vector<128x128xf32>
    %33 = arith.addf %30, %32 : vector<128x128xf32>
    %cst_24 = arith.constant 5.000000e-01 : f32
    %34 = vector.broadcast %cst_24 : f32 to vector<128x128xf32>
    %35 = arith.mulf %34, %33 : vector<128x128xf32>
    %36 = math.tanh %35 : vector<128x128xf32>
    %cst_25 = arith.constant 5.000000e-01 : f32
    %37 = vector.broadcast %cst_25 : f32 to vector<128x128xf32>
    %38 = arith.mulf %37, %36 : vector<128x128xf32>
    %cst_26 = arith.constant 5.000000e-01 : f32
    %39 = vector.broadcast %cst_26 : f32 to vector<128x128xf32>
    %40 = arith.addf %38, %39 : vector<128x128xf32>
    %41 = arith.truncf %40 : vector<128x128xf32> to vector<128x128xbf16>
    %c0_27 = arith.constant 0 : index
    %c0_28 = arith.constant 0 : index
    %42 = vector.load %arg10[%c0_27, %c0_28] : memref<128x128xbf16, #tpu.memory_space<vmem>>, vector<128x128xbf16>
    tpu.vector_store %arg10[%c0_27, %c0_28], %41 {strides = array<i32>} : memref<128x128xbf16, #tpu.memory_space<vmem>>, vector<128x128xbf16>,
    return
  }
  func.func @transform_0(%arg0: i32) -> (i32, i32) {
    %c0_i32 = arith.constant 0 : i32
    %c0_i32_0 = arith.constant 0 : i32
    return %arg0, %c0_i32 : i32, i32
  }
  func.func @transform_1(%arg0: i32) -> (i32, i32) {
    %c0_i32 = arith.constant 0 : i32
    %c0_i32_0 = arith.constant 0 : i32
    return %arg0, %c0_i32 : i32, i32
  }
  func.func @transform_2(%arg0: i32) -> (i32, i32) {
    %c0_i32 = arith.constant 0 : i32
    %c0_i32_0 = arith.constant 0 : i32
    %c0_i32_1 = arith.constant 0 : i32
    return %c0_i32, %c0_i32_0 : i32, i32
  }
  func.func @transform_3(%arg0: i32) -> (i32, i32) {
    %c0_i32 = arith.constant 0 : i32
    %c0_i32_0 = arith.constant 0 : i32
    %c0_i32_1 = arith.constant 0 : i32
    return %c0_i32, %c0_i32_0 : i32, i32
  }
  func.func @transform_4(%arg0: i32) -> (i32, i32) {
    %c0_i32 = arith.constant 0 : i32
    %c0_i32_0 = arith.constant 0 : i32
    %c0_i32_1 = arith.constant 0 : i32
    return %c0_i32, %c0_i32_0 : i32, i32
  }
  func.func @transform_5(%arg0: i32) -> (i32, i32) {
    %c0_i32 = arith.constant 0 : i32
    %c0_i32_0 = arith.constant 0 : i32
    %c0_i32_1 = arith.constant 0 : i32
    return %c0_i32, %c0_i32_0 : i32, i32
  }
  func.func @transform_6(%arg0: i32) -> (i32, i32) {
    %c0_i32 = arith.constant 0 : i32
    %c0_i32_0 = arith.constant 0 : i32
    %c0_i32_1 = arith.constant 0 : i32
    return %c0_i32, %c0_i32_0 : i32, i32
  }
  func.func @transform_7(%arg0: i32) -> (i32, i32) {
    %c0_i32 = arith.constant 0 : i32
    %c0_i32_0 = arith.constant 0 : i32
    %c0_i32_1 = arith.constant 0 : i32
    return %c0_i32, %c0_i32_0 : i32, i32
  }
  func.func @transform_8(%arg0: i32) -> (i32, i32) {
    %c0_i32 = arith.constant 0 : i32
    %c0_i32_0 = arith.constant 0 : i32
    %c0_i32_1 = arith.constant 0 : i32
    return %c0_i32, %c0_i32_0 : i32, i32
  }
  func.func @transform_9(%arg0: i32) -> (i32, i32) {
    %c0_i32 = arith.constant 0 : i32
    %c0_i32_0 = arith.constant 0 : i32
    return %arg0, %c0_i32 : i32, i32
  }
  func.func @transform_10(%arg0: i32) -> (i32, i32) {
    %c0_i32 = arith.constant 0 : i32
    %c0_i32_0 = arith.constant 0 : i32
    return %arg0, %c0_i32 : i32, i32
  }
}

</mosaic_0001>

<bundles_post_ra>
// kernel: cvae_forward.1
= control target key start
LH: loop header
LB: loop body
LE: loop exit
PB: predicated region body
PF: predicated region fallthrough
CT: control target
= control target key end

     0   :  { %s2631_s13 = smov 0   ;;  %s3330_s0 = inlined_call_operand.vmem [shape: bf16[256,128], index: 0, kind: input, shape index: {}]   ;;  %s3331_s1 = inlined_call_operand.vmem [shape: f32[256,64], index: 1, kind: input, shape index: {}]   ;;  %s3332_s2 = inlined_call_operand.vmem [shape: bf16[128,512], index: 2, kind: input, shape index: {}]   ;;  %s3333_s3 = inlined_call_operand.vmem [shape: f32[1,512], index: 3, kind: input, shape index: {}]   ;;  %s3334_s4 = inlined_call_operand.vmem [shape: bf16[256,128], index: 4, kind: input, shape index: {}]   ;;  %s3335_s5 = inlined_call_operand.vmem [shape: f32[1,128], index: 5, kind: input, shape index: {}]   ;;  %s3336_s6 = inlined_call_operand.vmem [shape: bf16[64,256], index: 6, kind: input, shape index: {}]   ;;  %s3337_s7 = inlined_call_operand.vmem [shape: bf16[256,128], index: 7, kind: input, shape index: {}]   ;;  %s3338_s8 = inlined_call_operand.vmem [shape: f32[1,128], index: 8, kind: input, shape index: {}]   ;;  %s3339_s9 = inlined_call_operand.vmem [shape: bf16[256,128], index: 9, kind: output, shape index: {0}]   ;;  %s3340_s10 = inlined_call_operand.vmem [shape: f32[256,128], index: 10, kind: output, shape index: {1}]  }
   0x1 LB: > { %s2096_s14 = sadd.s32 4294967295, %s2572_s13   ;;  %p2100_p0 = scmp.ge.s32.totalorder %s2572_s13, 1  ;;  %s2572_s13 = sphi %s2631_s13, %s21_s13  }
   0x2   : > { %p327_p1 = scmp.lt.s32.totalorder %s2572_s13, 3 }
   0x4   : > { %p328_p2 = pnand %p2100_p0, %p327_p1 }
   0x5   : > { %s2101_s17 = sshll.u32 (!%p328_p2), %s2096_s14, 4  ;;  %s2575_s21 = smov (!%p328_p2), 64  }
   0x6   : > { %331 = sbr.rel (%p328_p2) target bundleno = 1063 (0x427), region = 56  ;;  %p376_p3 = scmp.lt.s32.totalorder (!%p328_p2), %s2101_s17, 31 }
   0xb   : > { %v2434_v0 = vld [vmem:[%s3332_s2 + $0xe4] ss:$16 sps:$4 sm:$0xff]   ;;  %v2436_v1 = vld [vmem:[%s3332_s2 + $0xe0] ss:$16 sps:$4 sm:$0xff]   ;;  %v2574_v2 = vmov 0   ;;  %s3342_s17 = smov (!%p376_p3, %s2101_s17), 31  ;;  %v450_v57 = vlaneseq }
   0xc   : > { %710 = vmatprep.mubr.bf16.mxu0 %v2574_v2  ;;  %750 = vmatprep.mubr.bf16.mxu1 %v2574_v2  ;;  %v2437_v3 = vld [vmem:[%s3332_s2 + $0xc4] ss:$16 sps:$4 sm:$0xff]   ;;  %v2439_v4 = vld [vmem:[%s3332_s2 + $0xc0] ss:$16 sps:$4 sm:$0xff]   ;;  %s2102_s26 = sshll.u32 %s3342_s17, 2  ;;  %v2466_v19 = vld [vmem:[%s3334_s4 + $0x78] sm:$0xff]  }
   0xd   : > { %678 = vmatprep.subr.bf16.mxu0 %v2434_v0  ;;  %2408 = vmatprep.subr.bf16.mxu1 %v2434_v0  ;;  %v2440_v5 = vld [vmem:[%s3332_s2 + $0xa4] ss:$16 sps:$4 sm:$0xff]   ;;  %v2442_v6 = vld [vmem:[%s3332_s2 + $0xa0] ss:$16 sps:$4 sm:$0xff]   ;;  %s2670_s14 = scalar_lea.vmem %s3330_s0, %s2102_s26  ;;  %v2467_v20 = vld [vmem:[%s3334_s4 + $0x38] sm:$0xff]   ;;  %s2104_s16 = sshll.u32 %s3342_s17, 3 }
   0xe   : > { %679 = vmatpush1.bf16.msra.mxu0 %v2436_v1  ;;  %2416 = vmatpush1.bf16.msra.mxu1 %v2436_v1  ;;  %v2443_v7 = vld [vmem:[%s3332_s2 + $0x84] ss:$16 sps:$4 sm:$0xff]   ;;  %v2445_v8 = vld [vmem:[%s3332_s2 + $0x80] ss:$16 sps:$4 sm:$0xff]   ;;  %v2470_v23 = vld [vmem:[%s3334_s4 + $0x68] sm:$0xff]   ;;  %s2792_s20 = scalar_lea.vmem %s3331_s1, %s2104_s16  ;;  %v2826_v58 = vshrl.u32 %v450_v57, 7  ;;  %s2986_s11 = scalar_lea.vmem %s3340_s10, %s2104_s16 }
   0xf   : > { %680 = vmatprep.subr.bf16.mxu0 %v2437_v3  ;;  %2409 = vmatprep.subr.bf16.mxu1 %v2437_v3  ;;  %v2446_v9 = vld [vmem:[%s3332_s2 + $0x64] ss:$16 sps:$4 sm:$0xff]   ;;  %v2448_v10 = vld [vmem:[%s3332_s2 + $0x60] ss:$16 sps:$4 sm:$0xff]   ;;  %v2725_v24 = vld [vmem:[%s2670_s14 + $0x8] sm:$0xff]   ;;  %vm1432_vm0 = vcmask 523264   ;;  %s3308_s18 = scalar_lea.vmem %s3339_s9, %s2102_s26 }
  0x10   : > { %v2449_v11 = vld [vmem:[%s3332_s2 + $0x44] ss:$16 sps:$4 sm:$0xff]   ;;  %v2451_v12 = vld [vmem:[%s3332_s2 + $0x40] ss:$16 sps:$4 sm:$0xff]   ;;  %v2728_v25 = vld [vmem:[%s2670_s14 + $0x28] sm:$0xff]   ;;  %v456_v59 = vsub.s32 1, %v2826_v58 }
  0x11   : > { %v2452_v13 = vld [vmem:[%s3332_s2 + $0x24] ss:$16 sps:$4 sm:$0xff]   ;;  %v2454_v14 = vld [vmem:[%s3332_s2 + $0x20] ss:$16 sps:$4 sm:$0xff]   ;;  %v2471_v26 = vld [vmem:[%s3334_s4 + $0x28] sm:$0xff]   ;;  %v452_v60 = vsub.s32 0, %v2826_v58 }
  0x12   : > { %681 = vmatpush1.bf16.msra.mxu0 %v2439_v4  ;;  %2417 = vmatpush1.bf16.msra.mxu1 %v2439_v4  ;;  %v2455_v15 = vld [vmem:[%s3332_s2 + $0x4] ss:$16 sps:$4 sm:$0xff]   ;;  %v2457_v16 = vld [vmem:[%s3332_s2] ss:$16 sps:$4 sm:$0xff]   ;;  %v2474_v29 = vld [vmem:[%s3334_s4 + $0x58] sm:$0xff]  }
  0x13   : > { %682 = vmatprep.subr.bf16.mxu0 %v2440_v5  ;;  %2410 = vmatprep.subr.bf16.mxu1 %v2440_v5  ;;  %v2700_v17 = vld [vmem:[%s2670_s14] sm:$0xff]   ;;  %v2468_v21 = vld [vmem:[%s3334_s4 + $0x70] sm:$0xff]   ;;  %v2475_v32 = vld [vmem:[%s3334_s4 + $0x18] sm:$0xff]  }
  0x14   : > { %v2703_v18 = vld [vmem:[%s2670_s14 + $0x20] sm:$0xff]   ;;  %v2469_v22 = vld [vmem:[%s3334_s4 + $0x30] sm:$0xff]   ;;  %v2760_v33 = vld [vmem:[%s2670_s14 + $0x18] sm:$0xff]  }
  0x15   : > { %v2472_v27 = vld [vmem:[%s3334_s4 + $0x60] sm:$0xff]   ;;  %v2747_v30 = vld [vmem:[%s2670_s14 + $0x10] sm:$0xff]   ;;  %v2763_v34 = vld [vmem:[%s2670_s14 + $0x38] sm:$0xff]  }
  0x16   : > { %683 = vmatpush1.bf16.msra.mxu0 %v2442_v6  ;;  %2418 = vmatpush1.bf16.msra.mxu1 %v2442_v6  ;;  %v2473_v28 = vld [vmem:[%s3334_s4 + $0x20] sm:$0xff]   ;;  %v2750_v31 = vld [vmem:[%s2670_s14 + $0x30] sm:$0xff]   ;;  %v2478_v37 = vld [vmem:[%s3334_s4 + $0x48] sm:$0xff]  }
  0x17   : > { %684 = vmatprep.subr.bf16.mxu0 %v2443_v7  ;;  %2411 = vmatprep.subr.bf16.mxu1 %v2443_v7  ;;  %v2476_v35 = vld [vmem:[%s3334_s4 + $0x50] sm:$0xff]   ;;  %v2479_v38 = vld [vmem:[%s3334_s4 + $0x8] sm:$0xff]   ;;  %v2480_v39 = vld [vmem:[%s3334_s4 + $0x40] sm:$0xff]  }
  0x18   : > { %v2477_v36 = vld [vmem:[%s3334_s4 + $0x10] sm:$0xff]   ;;  %v2481_v40 = vld [vmem:[%s3334_s4] sm:$0xff]   ;;  %v1201_v43 = vld [vmem:[%s2792_s20 + $0x8] sm:$0xff] }
  0x19   : > { %v1200_v41 = vld [vmem:[%s2792_s20] sm:$0xff]  ;;  %v1202_v42 = vld [vmem:[%s2792_s20 + $0x10] sm:$0xff]  ;;  %v1203_v44 = vld [vmem:[%s2792_s20 + $0x18] sm:$0xff] }
  0x1a   : > { %685 = vmatpush1.bf16.msra.mxu0 %v2445_v8  ;;  %2419 = vmatpush1.bf16.msra.mxu1 %v2445_v8  ;;  %v1204_v45 = vld [vmem:[%s2792_s20 + $0x20] sm:$0xff]  ;;  %v1205_v46 = vld [vmem:[%s2792_s20 + $0x28] sm:$0xff]  ;;  %v1206_v47 = vld [vmem:[%s2792_s20 + $0x30] sm:$0xff] }
  0x1b   : > { %686 = vmatprep.subr.bf16.mxu0 %v2446_v9  ;;  %2412 = vmatprep.subr.bf16.mxu1 %v2446_v9  ;;  %v1207_v48 = vld [vmem:[%s2792_s20 + $0x38] sm:$0xff]  ;;  %v1208_v49 = vld [vmem:[%s2792_s20 + $0x40] sm:$0xff]  ;;  %v1209_v50 = vld [vmem:[%s2792_s20 + $0x48] sm:$0xff] }
  0x1c   : > { %1232 = vrot.lane.b32.xlu0 %v1200_v41, %s2575_s21  ;;  %1236 = vrot.lane.b32.xlu1 %v1202_v42, %s2575_s21  ;;  %v1210_v51 = vld [vmem:[%s2792_s20 + $0x50] sm:$0xff]  ;;  %v1211_v52 = vld [vmem:[%s2792_s20 + $0x58] sm:$0xff] }
  0x1d   : > { %v1212_v53 = vld [vmem:[%s2792_s20 + $0x60] sm:$0xff]  ;;  %v1213_v54 = vld [vmem:[%s2792_s20 + $0x68] sm:$0xff]  ;;  %v1214_v55 = vld [vmem:[%s2792_s20 + $0x70] sm:$0xff] }
  0x1e   : > { %687 = vmatpush1.bf16.msra.mxu0 %v2448_v10  ;;  %2420 = vmatpush1.bf16.msra.mxu1 %v2448_v10  ;;  %v1215_v56 = vld [vmem:[%s2792_s20 + $0x78] sm:$0xff]  ;;  %v2833_v61 = vld [vmem:[%s3333_s3] sm:$0xf] }
  0x1f   : > { %688 = vmatprep.subr.bf16.mxu0 %v2449_v11  ;;  %2413 = vmatprep.subr.bf16.mxu1 %v2449_v11  ;;  %v2838_v0 = vrot.slane %v2833_v61, %v456_v59  ;;  %v2841_v1 = vrot.slane %v2833_v61, %v452_v60 }
  0x20   : > { %1234 = vrot.lane.b32.xlu0 %v1201_v43, %s2575_s21  ;;  %1238 = vrot.lane.b32.xlu1 %v1203_v44, %s2575_s21 }
  0x22   : > { %689 = vmatpush1.bf16.msra.mxu0 %v2451_v12  ;;  %2421 = vmatpush1.bf16.msra.mxu1 %v2451_v12 }
  0x23   : > { %690 = vmatprep.subr.bf16.mxu0 %v2452_v13  ;;  %2414 = vmatprep.subr.bf16.mxu1 %v2452_v13 }
  0x24   : > { %1240 = vrot.lane.b32.xlu0 %v1204_v45, %s2575_s21  ;;  %1242 = vrot.lane.b32.xlu1 %v1205_v46, %s2575_s21 }
  0x26   : > { %691 = vmatpush1.bf16.msra.mxu0 %v2454_v14  ;;  %2422 = vmatpush1.bf16.msra.mxu1 %v2454_v14 }
  0x27   : > { %692 = vmatprep.subr.bf16.mxu0 %v2455_v15  ;;  %2415 = vmatprep.subr.bf16.mxu1 %v2455_v15 }
  0x28   : > { %1244 = vrot.lane.b32.xlu0 %v1206_v47, %s2575_s21  ;;  %1246 = vrot.lane.b32.xlu1 %v1207_v48, %s2575_s21 }
  0x2a   : > { %693 = vmatpush1.bf16.msra.mxu0 %v2457_v16  ;;  %2423 = vmatpush1.bf16.msra.mxu1 %v2457_v16 }
  0x2b   : > { %2280 = vmatprep.subr.bf16.mxu0 %v2466_v19 }
  0x2c   : > { %1248 = vrot.lane.b32.xlu0 %v1208_v49, %s2575_s21  ;;  %1250 = vrot.lane.b32.xlu1 %v1209_v50, %s2575_s21 }
  0x2d   : > { %711 = vmatmul.mubr.bf16.vlgmr.msra.gmra.mxu0 %v2700_v17  ;;  %751 = vmatmul.mubr.bf16.vlgmr.msra.gmra.mxu1 %v2703_v18 }
  0x2e   : > { %720 = vmatprep.mubr.bf16.mxu0 %v2574_v2  ;;  %760 = vmatprep.mubr.bf16.mxu1 %v2574_v2 }
  0x2f   : > { %2281 = vmatpush3.bf16.msra.mxu0 %v2467_v20 }
  0x30   : > { %2282 = vmatprep.subr.bf16.mxu0 %v2468_v21  ;;  %1252 = vrot.lane.b32.xlu0 %v1210_v51, %s2575_s21 }
  0x31   : > { %1254 = vrot.lane.b32.xlu1 %v1211_v52, %s2575_s21 }
  0x33   : > { %2283 = vmatpush3.bf16.msra.mxu0 %v2469_v22 }
  0x34   : > { %2284 = vmatprep.subr.bf16.mxu0 %v2470_v23  ;;  %1256 = vrot.lane.b32.xlu0 %v1212_v53, %s2575_s21 }
  0x35   : > { %721 = vmatmul.mubr.bf16.gmra.mxu0 %v2725_v24  ;;  %761 = vmatmul.mubr.bf16.gmra.mxu1 %v2728_v25 }
  0x36   : > { %730 = vmatprep.mubr.bf16.mxu0 %v2574_v2  ;;  %770 = vmatprep.mubr.bf16.mxu1 %v2574_v2 }
  0x37   : > { %2285 = vmatpush3.bf16.msra.mxu0 %v2471_v26  ;;  %1258 = vrot.lane.b32.xlu1 %v1213_v54, %s2575_s21 }
  0x38   : > { %2286 = vmatprep.subr.bf16.mxu0 %v2472_v27  ;;  %1260 = vrot.lane.b32.xlu0 %v1214_v55, %s2575_s21 }
  0x3b   : > { %2287 = vmatpush3.bf16.msra.mxu0 %v2473_v28  ;;  %1262 = vrot.lane.b32.xlu1 %v1215_v56, %s2575_s21 }
  0x3c   : > { %2288 = vmatprep.subr.bf16.mxu0 %v2474_v29 }
  0x3d   : > { %731 = vmatmul.mubr.bf16.gmra.mxu0 %v2747_v30  ;;  %771 = vmatmul.mubr.bf16.gmra.mxu1 %v2750_v31 }
  0x3e   : > { %740 = vmatprep.mubr.bf16.mxu0 %v2574_v2  ;;  %780 = vmatprep.mubr.bf16.mxu1 %v2574_v2 }
  0x3f   : > { %2289 = vmatpush3.bf16.msra.mxu0 %v2475_v32 }
  0x40   : > { %2290 = vmatprep.subr.bf16.mxu0 %v2476_v35 }
  0x43   : > { %2291 = vmatpush3.bf16.msra.mxu0 %v2477_v36 }
  0x44   : > { %2292 = vmatprep.subr.bf16.mxu0 %v2478_v37 }
  0x45   : > { %741 = vmatmul.mubr.bf16.gmra.mxu0 %v2760_v33  ;;  %781 = vmatmul.mubr.bf16.gmra.mxu1 %v2763_v34 }
  0x46   : > { %823 = vmatprep.mubr.bf16.mxu1 %v2574_v2 }
  0x47   : > { %2293 = vmatpush3.bf16.msra.mxu0 %v2479_v38 }
  0x48   : > { %2294 = vmatprep.subr.bf16.mxu0 %v2480_v39 }
  0x4b   : > { %2295 = vmatpush3.bf16.msra.mxu0 %v2481_v40 }
  0xed   : > { %v712_v62 = vpop.f32.mrf.mxu0  ;;  %v2835_v63 = vpop.f32.mrf.mxu1 }
  0xee   : > { %v713_v9 = vadd.f32 %v712_v62, %v2841_v1 }
  0xef   : > { %v714_v3 = vpop.f32.mrf.mxu0  ;;  %v754_v4 = vpop.f32.mrf.mxu1 }
  0xf0   : > { %v715_v7 = vadd.f32 %v714_v3, %v2838_v0  ;;  %v904_v20 = vmax.f32 %v713_v9, 0.0 }
  0xf1   : > { %v716_v5 = vpop.f32.mrf.mxu0  ;;  %v2843_v6 = vpop.f32.mrf.mxu1 }
  0xf2   : > { %v717_v8 = vadd.f32 %v716_v5, %v2841_v1  ;;  %v905_v16 = vmax.f32 %v715_v7, 0.0  ;;  %v755_v5 = vadd.f32 %v754_v4, %v2838_v0 }
  0xf3   : > { %v718_v10 = vpop.f32.mrf.mxu0  ;;  %v758_v11 = vpop.f32.mrf.mxu1 }
  0xf4   : > { %v719_v12 = vadd.f32 %v718_v10, %v2838_v0  ;;  %v906_v13 = vmax.f32 %v717_v8, 0.0  ;;  %v759_v7 = vadd.f32 %v758_v11, %v2838_v0 }
  0xf5   : > { %v722_v14 = vpop.f32.mrf.mxu0  ;;  %v2849_v15 = vpop.f32.mrf.mxu1 }
  0xf6   : > { %v907_v19 = vmax.f32 %v719_v12, 0.0  ;;  %v936_v26 = vpack.c.bf16 %v906_v13, %v904_v20  ;;  %v723_v35 = vadd.f32 %v722_v14, %v2841_v1 }
  0xf7   : > { %v724_v21 = vpop.f32.mrf.mxu0  ;;  %v764_v22 = vpop.f32.mrf.mxu1 }
  0xf8   : > { %v937_v23 = vpack.c.bf16 %v907_v19, %v905_v16  ;;  %v725_v29 = vadd.f32 %v724_v21, %v2838_v0  ;;  %v908_v43 = vmax.f32 %v723_v35, 0.0  ;;  %v921_v19 = vmax.f32 %v755_v5, 0.0 }
  0xf9   : > { %v726_v27 = vpop.f32.mrf.mxu0  ;;  %v2851_v28 = vpop.f32.mrf.mxu1  ;;  %v923_v21 = vmax.f32 %v759_v7, 0.0  ;;  %v765_v35 = vadd.f32 %v764_v22, %v2838_v0 }
  0xfa   : > { %v727_v32 = vadd.f32 %v726_v27, %v2841_v1  ;;  %1119 = vmatprep.mubr.bf16.mxu0 %v937_v23  ;;  %v909_v41 = vmax.f32 %v725_v29, 0.0 }
  0xfb   : > { %v728_v36 = vpop.f32.mrf.mxu0  ;;  %1120 = vmatmul.mubr.bf16.vlgmr.msra.gmra.mxu0 %v936_v26  ;;  %v768_v40 = vpop.f32.mrf.mxu1 }
  0xfc   : > { %v729_v37 = vadd.f32 %v728_v36, %v2838_v0  ;;  %v910_v38 = vmax.f32 %v727_v32, 0.0  ;;  %v945_v32 = vpack.c.bf16 %v923_v21, %v921_v19  ;;  %v769_v36 = vadd.f32 %v768_v40, %v2838_v0  ;;  %v2485_v19 = vld [vmem:[%s3332_s2 + $0xc8] ss:$16 sps:$4 sm:$0xff]  }
  0xfd   : > { %v732_v39 = vpop.f32.mrf.mxu0  ;;  %v2857_v48 = vpop.f32.mrf.mxu1  ;;  %v2488_v21 = vld [vmem:[%s3332_s2 + $0xa8] ss:$16 sps:$4 sm:$0xff]  }
  0xfe   : > { %v911_v42 = vmax.f32 %v729_v37, 0.0  ;;  %v938_v46 = vpack.c.bf16 %v910_v38, %v908_v43  ;;  %v733_v51 = vadd.f32 %v732_v39, %v2841_v1  ;;  %v753_v37 = vadd.f32 %v2835_v63, %v2841_v1 }
  0xff   : > { %v734_v44 = vpop.f32.mrf.mxu0  ;;  %v774_v56 = vpop.f32.mrf.mxu1  ;;  %v757_v39 = vadd.f32 %v2843_v6, %v2841_v1  ;;  %v927_v43 = vmax.f32 %v769_v36, 0.0  ;;  %v763_v63 = vadd.f32 %v2849_v15, %v2841_v1  ;;  %v767_v6 = vadd.f32 %v2851_v28, %v2841_v1  ;;  %v2505_v36 = vld [vmem:[%s3332_s2 + $0xc] ss:$16 sps:$4 sm:$0xff]  }
 0x100   : > { %v939_v45 = vpack.c.bf16 %v911_v42, %v909_v41  ;;  %v735_v49 = vadd.f32 %v734_v44, %v2838_v0  ;;  %v912_v60 = vmax.f32 %v733_v51, 0.0  ;;  %v925_v42 = vmax.f32 %v765_v35, 0.0  ;;  %v2500_v35 = vld [vmem:[%s3332_s2 + $0x28] ss:$16 sps:$4 sm:$0xff]  }
 0x101   : > { %v736_v47 = vpop.f32.mrf.mxu0  ;;  %v776_v10 = vpop.f32.mrf.mxu1  ;;  %v920_v44 = vmax.f32 %v753_v37, 0.0  ;;  %v775_v22 = vadd.f32 %v774_v56, %v2838_v0  ;;  %v773_v15 = vadd.f32 %v2857_v48, %v2841_v1  ;;  %v2484_v48 = vld [vmem:[%s3332_s2 + $0xec] ss:$16 sps:$4 sm:$0xff]   ;;  %v2503_v37 = vld [vmem:[%s3332_s2 + $0x8] ss:$16 sps:$4 sm:$0xff]  }
 0x102   : > { %v737_v50 = vadd.f32 %v736_v47, %v2841_v1  ;;  %1127 = vmatprep.mubr.bf16.mxu0 %v939_v45  ;;  %v913_v57 = vmax.f32 %v735_v49, 0.0  ;;  %v922_v45 = vmax.f32 %v757_v39, 0.0  ;;  %v947_v47 = vpack.c.bf16 %v927_v43, %v925_v42  ;;  %791 = vmatprep.subr.bf16.mxu1 %v2484_v48  ;;  %v2508_v39 = vld [vmem:[%s3336_s6 + $0x34] ss:$8 sps:$4 sm:$0xff]   ;;  %v2512_v43 = vld [vmem:[%s3336_s6 + $0x10] ss:$8 sps:$4 sm:$0xff]  }
 0x103   : > { %v738_v52 = vpop.f32.mrf.mxu0  ;;  %1128 = vmatmul.mubr.bf16.gmra.mxu0 %v938_v46  ;;  %v778_v4 = vpop.f32.mrf.mxu1  ;;  %v929_v51 = vmax.f32 %v775_v22, 0.0  ;;  %v928_v5 = vmax.f32 %v773_v15, 0.0  ;;  %v2514_v42 = vld [vmem:[%s3336_s6 + $0x14] ss:$8 sps:$4 sm:$0xff]  }
 0x104   : > { %v739_v53 = vadd.f32 %v738_v52, %v2838_v0  ;;  %v914_v54 = vmax.f32 %v737_v50, 0.0  ;;  %v779_v40 = vadd.f32 %v778_v4, %v2838_v0  ;;  %v944_v49 = vpack.c.bf16 %v922_v45, %v920_v44  ;;  %v2491_v4 = vld [vmem:[%s3332_s2 + $0x88] ss:$16 sps:$4 sm:$0xff]   ;;  %v2517_v44 = vld [vmem:[%s3336_s6 + $0x4] ss:$8 sps:$4 sm:$0xff]   ;;  %v1233_v45 = vpop.permute.xlu0 %1232 }
 0x105   : > { %v742_v55 = vpop.f32.mrf.mxu0  ;;  %v782_v41 = vpop.f32.mrf.mxu1 }
 0x106   : > { %v915_v59 = vmax.f32 %v739_v53, 0.0  ;;  %v940_v8 = vpack.c.bf16 %v914_v54, %v912_v60  ;;  %v743_v14 = vadd.f32 %v742_v55, %v2841_v1  ;;  %v931_v52 = vmax.f32 %v779_v40, 0.0 }
 0x107   : > { %v744_v62 = vpop.f32.mrf.mxu0  ;;  %v784_v46 = vpop.f32.mrf.mxu1  ;;  %v924_v53 = vmax.f32 %v763_v63, 0.0  ;;  %v926_v54 = vmax.f32 %v767_v6, 0.0 }
 0x108   : > { %v941_v3 = vpack.c.bf16 %v915_v59, %v913_v57  ;;  %v745_v12 = vadd.f32 %v744_v62, %v2838_v0  ;;  %v916_v27 = vmax.f32 %v743_v14, 0.0  ;;  %v949_v57 = vpack.c.bf16 %v931_v52, %v929_v51 }
 0x109   : > { %v746_v9 = vpop.f32.mrf.mxu0  ;;  %v786_v50 = vpop.f32.mrf.mxu1  ;;  %v785_v56 = vadd.f32 %v784_v46, %v2838_v0  ;;  %v946_v60 = vpack.c.bf16 %v926_v54, %v924_v53  ;;  %v777_v62 = vadd.f32 %v776_v10, %v2841_v1  ;;  %v2482_v10 = vld [vmem:[%s3332_s2 + $0xe8] ss:$16 sps:$4 sm:$0xff]  }
 0x10a   : > { %v747_v13 = vadd.f32 %v746_v9, %v2841_v1  ;;  %1135 = vmatprep.mubr.bf16.mxu0 %v941_v3  ;;  %v917_v26 = vmax.f32 %v745_v12, 0.0  ;;  %v783_v12 = vadd.f32 %v782_v41, %v2841_v1  ;;  %792 = vmatpush1.bf16.msra.mxu1 %v2482_v10  ;;  %v2511_v41 = vld [vmem:[%s3336_s6 + $0x24] ss:$8 sps:$4 sm:$0xff]  }
 0x10b   : > { %v748_v16 = vpop.f32.mrf.mxu0  ;;  %1136 = vmatmul.mubr.bf16.gmra.mxu0 %v940_v8  ;;  %v788_v55 = vpop.f32.mrf.mxu1  ;;  %v933_v28 = vmax.f32 %v785_v56, 0.0  ;;  %v930_v7 = vmax.f32 %v777_v62, 0.0 }
 0x10c   : > { %v749_v20 = vadd.f32 %v748_v16, %v2838_v0  ;;  %v918_v23 = vmax.f32 %v747_v13, 0.0  ;;  %v789_v59 = vadd.f32 %v788_v55, %v2838_v0  ;;  %v787_v13 = vadd.f32 %v786_v50, %v2841_v1  ;;  %v2487_v1 = vld [vmem:[%s3332_s2 + $0xcc] ss:$16 sps:$4 sm:$0xff]   ;;  %v1237_v50 = vpop.permute.xlu1 %1236 }
 0x10d   : > { %v948_v9 = vpack.c.bf16 %v930_v7, %v928_v5  ;;  %v932_v0 = vmax.f32 %v783_v12, 0.0  ;;  %793 = vmatprep.subr.bf16.mxu1 %v2487_v1 }
 0x10e   : > { %v919_v11 = vmax.f32 %v749_v20, 0.0  ;;  %v942_v38 = vpack.c.bf16 %v918_v23, %v916_v27  ;;  %v935_v3 = vmax.f32 %v789_v59, 0.0  ;;  %v934_v14 = vmax.f32 %v787_v13, 0.0  ;;  %794 = vmatpush1.bf16.msra.mxu1 %v2485_v19  ;;  %v2490_v20 = vld [vmem:[%s3332_s2 + $0xac] ss:$16 sps:$4 sm:$0xff]  }
 0x10f   : > { %795 = vmatprep.subr.bf16.mxu1 %v2490_v20  ;;  %v2493_v23 = vld [vmem:[%s3332_s2 + $0x8c] ss:$16 sps:$4 sm:$0xff]  }
 0x110   : > { %v943_v29 = vpack.c.bf16 %v919_v11, %v917_v26  ;;  %v951_v8 = vpack.c.bf16 %v935_v3, %v933_v28  ;;  %v950_v16 = vpack.c.bf16 %v934_v14, %v932_v0  ;;  %v2496_v26 = vld [vmem:[%s3332_s2 + $0x6c] ss:$16 sps:$4 sm:$0xff]   ;;  %v2494_v11 = vld [vmem:[%s3332_s2 + $0x68] ss:$16 sps:$4 sm:$0xff]  }
 0x111   : > { %v2499_v27 = vld [vmem:[%s3332_s2 + $0x4c] ss:$16 sps:$4 sm:$0xff]  }
 0x112   : > { %1143 = vmatprep.mubr.bf16.mxu0 %v943_v29  ;;  %796 = vmatpush1.bf16.msra.mxu1 %v2488_v21  ;;  %v2497_v29 = vld [vmem:[%s3332_s2 + $0x48] ss:$16 sps:$4 sm:$0xff]  }
 0x113   : > { %1144 = vmatmul.mubr.bf16.gmra.mxu0 %v942_v38  ;;  %797 = vmatprep.subr.bf16.mxu1 %v2493_v23  ;;  %v2506_v38 = vld [vmem:[%s3336_s6 + $0x30] ss:$8 sps:$4 sm:$0xff]  }
 0x114   : > { %1151 = vmatprep.mubr.bf16.mxu0 %v945_v32  ;;  %v2502_v32 = vld [vmem:[%s3332_s2 + $0x2c] ss:$16 sps:$4 sm:$0xff]  }
 0x116   : > { %798 = vmatpush1.bf16.msra.mxu1 %v2491_v4 }
 0x117   : > { %799 = vmatprep.subr.bf16.mxu1 %v2496_v26 }
 0x11a   : > { %800 = vmatpush1.bf16.msra.mxu1 %v2494_v11 }
 0x11b   : > { %1152 = vmatmul.mubr.bf16.gmra.mxu0 %v944_v49  ;;  %801 = vmatprep.subr.bf16.mxu1 %v2499_v27  ;;  %v1235_v49 = vpop.permute.xlu0 %1234 }
 0x11c   : > { %1159 = vmatprep.mubr.bf16.mxu0 %v947_v47 }
 0x11e   : > { %802 = vmatpush1.bf16.msra.mxu1 %v2497_v29 }
 0x11f   : > { %803 = vmatprep.subr.bf16.mxu1 %v2502_v32  ;;  %v1241_v7 = vpop.permute.xlu0 %1240 }
 0x122   : > { %804 = vmatpush1.bf16.msra.mxu1 %v2500_v35 }
 0x123   : > { %1160 = vmatmul.mubr.bf16.gmra.mxu0 %v946_v60  ;;  %805 = vmatprep.subr.bf16.mxu1 %v2505_v36  ;;  %v1239_v60 = vpop.permute.xlu1 %1238  ;;  %v1245_v20 = vpop.permute.xlu0 %1244 }
 0x124   : > { %1167 = vmatprep.mubr.bf16.mxu0 %v949_v57 }
 0x126   : > { %806 = vmatpush1.bf16.msra.mxu1 %v2503_v37 }
 0x127   : > { %1465 = vmatprep.subr.bf16.mxu1 %v2508_v39  ;;  %v1243_v14 = vpop.permute.xlu1 %1242 }
 0x129   : > { %824 = vmatmul.mubr.bf16.vlgmr.msra.gmra.mxu1 %v2700_v17  ;;  %v2509_v17 = vld [vmem:[%s3336_s6 + $0x20] ss:$8 sps:$4 sm:$0xff]  }
 0x12a   : > { %833 = vmatprep.mubr.bf16.mxu1 %v2574_v2  ;;  %1466 = vmatpush1.bf16.msra.mxu1 %v2506_v38  ;;  %v1249_v38 = vpop.permute.xlu0 %1248 }
 0x12b   : > { %1168 = vmatmul.mubr.bf16.gmra.mxu0 %v948_v9  ;;  %1467 = vmatprep.subr.bf16.mxu1 %v2511_v41  ;;  %v1247_v27 = vpop.permute.xlu1 %1246 }
 0x12c   : > { %1175 = vmatprep.mubr.bf16.mxu0 %v951_v8 }
 0x12e   : > { %1468 = vmatpush1.bf16.msra.mxu1 %v2509_v17 }
 0x12f   : > { %1469 = vmatprep.subr.bf16.mxu1 %v2514_v42 }
 0x131   : > { %834 = vmatmul.mubr.bf16.gmra.mxu1 %v2725_v24  ;;  %v2515_v24 = vld [vmem:[%s3336_s6] ss:$8 sps:$4 sm:$0xff]  }
 0x132   : > { %843 = vmatprep.mubr.bf16.mxu1 %v2574_v2  ;;  %1470 = vmatpush1.bf16.msra.mxu1 %v2512_v43 }
 0x133   : > { %1176 = vmatmul.mubr.bf16.gmra.mxu0 %v950_v16  ;;  %1471 = vmatprep.subr.bf16.mxu1 %v2517_v44  ;;  %v1251_v44 = vpop.permute.xlu1 %1250 }
 0x136   : > { %1472 = vmatpush1.bf16.msra.mxu1 %v2515_v24 }
 0x139   : > { %844 = vmatmul.mubr.bf16.gmra.mxu1 %v2747_v30 }
 0x13a   : > { %853 = vmatprep.mubr.bf16.mxu1 %v2574_v2 }
 0x141   : > { %854 = vmatmul.mubr.bf16.gmra.mxu1 %v2760_v33  ;;  %v2979_v33 = vld [vmem:[%s3335_s5] ss:$0 sm:$0xff] }
 0x142   : > { %863 = vmatprep.mubr.bf16.mxu1 %v2574_v2 }
 0x149   : > { %864 = vmatmul.mubr.bf16.gmra.mxu1 %v2703_v18 }
 0x14a   : > { %873 = vmatprep.mubr.bf16.mxu1 %v2574_v2 }
 0x151   : > { %874 = vmatmul.mubr.bf16.gmra.mxu1 %v2728_v25 }
 0x152   : > { %883 = vmatprep.mubr.bf16.mxu1 %v2574_v2 }
 0x159   : > { %884 = vmatmul.mubr.bf16.gmra.mxu1 %v2750_v31 }
 0x15a   : > { %893 = vmatprep.mubr.bf16.mxu1 %v2574_v2 }
 0x161   : > { %894 = vmatmul.mubr.bf16.gmra.mxu1 %v2763_v34 }
 0x162   : > { %1489 = vmatprep.mubr.bf16.mxu1 %v2574_v2 }
 0x1bb   : > { %v2296_v30 = vpop.f32.mrf.mxu0 }
 0x1bd   : > { %v2297_v18 = vpop.f32.mrf.mxu0 }
 0x1be   : > { %v2298_v46 = vadd.f32 %v2297_v18, %v2296_v30 }
 0x1bf   : > { %v2299_v25 = vpop.f32.mrf.mxu0 }
 0x1c0   : > { %v2989_v31 = vadd.f32 %v2298_v46, %v2979_v33 }
 0x1c1   : > { %v2300_v34 = vpop.f32.mrf.mxu0 }
 0x1c2   : > { %1184 = vst [vmem:[%s2986_s11] sm:$0xff] %v2989_v31  ;;  %v1280_v47 = vmul.f32 %v1233_v45, %v2989_v31  ;;  %v2301_v22 = vadd.f32 %v2300_v34, %v2299_v25  ;;  %v1253_v25 = vpop.permute.xlu0 %1252 }
 0x1c3   : > { %v2302_v40 = vpop.f32.mrf.mxu0 }
 0x1c4   : > { %v2995_v63 = vadd.f32 %v2301_v22, %v2979_v33  ;;  %1312 = vrot.lane.b32.xlu0 %v1280_v47, %s2575_s21 }
 0x1c5   : > { %v2303_v6 = vpop.f32.mrf.mxu0 }
 0x1c6   : > { %1185 = vst [vmem:[%s2986_s11 + $0x8] sm:$0xff] %v2995_v63  ;;  %v1281_v51 = vmul.f32 %v1235_v49, %v2995_v63  ;;  %v2304_v52 = vadd.f32 %v2303_v6, %v2302_v40  ;;  %v1255_v6 = vpop.permute.xlu1 %1254 }
 0x1c7   : > { %v2305_v53 = vpop.f32.mrf.mxu0 }
 0x1c8   : > { %v3002_v54 = vadd.f32 %v2304_v52, %v2979_v33  ;;  %1314 = vrot.lane.b32.xlu1 %v1281_v51, %s2575_s21 }
 0x1c9   : > { %v2306_v55 = vpop.f32.mrf.mxu0 }
 0x1ca   : > { %1186 = vst [vmem:[%s2986_s11 + $0x10] sm:$0xff] %v3002_v54  ;;  %v1282_v57 = vmul.f32 %v1237_v50, %v3002_v54  ;;  %v2307_v56 = vadd.f32 %v2306_v55, %v2305_v53 }
 0x1cb   : > { %v2308_v59 = vpop.f32.mrf.mxu0 }
 0x1cc   : > { %v3009_v15 = vadd.f32 %v2307_v56, %v2979_v33  ;;  %1316 = vrot.lane.b32.xlu0 %v1282_v57, %s2575_s21  ;;  %v1257_v57 = vpop.permute.xlu0 %1256 }
 0x1cd   : > { %v2309_v62 = vpop.f32.mrf.mxu0 }
 0x1ce   : > { %1187 = vst [vmem:[%s2986_s11 + $0x18] sm:$0xff] %v3009_v15  ;;  %v1283_v28 = vmul.f32 %v1239_v60, %v3009_v15  ;;  %v2310_v3 = vadd.f32 %v2309_v62, %v2308_v59 }
 0x1cf   : > { %v2311_v5 = vpop.f32.mrf.mxu0 }
 0x1d0   : > { %v3016_v8 = vadd.f32 %v2310_v3, %v2979_v33  ;;  %1318 = vrot.lane.b32.xlu1 %v1283_v28, %s2575_s21  ;;  %v1259_v3 = vpop.permute.xlu1 %1258 }
 0x1d1   : > { %v2312_v9 = vpop.f32.mrf.mxu0 }
 0x1d2   : > { %1188 = vst [vmem:[%s2986_s11 + $0x20] sm:$0xff] %v3016_v8  ;;  %v1284_v12 = vmul.f32 %v1241_v7, %v3016_v8  ;;  %v2313_v13 = vadd.f32 %v2312_v9, %v2311_v5 }
 0x1d3   : > { %v2314_v0 = vpop.f32.mrf.mxu0 }
 0x1d4   : > { %v3023_v16 = vadd.f32 %v2313_v13, %v2979_v33  ;;  %1320 = vrot.lane.b32.xlu0 %v1284_v12, %s2575_s21 }
 0x1d5   : > { %v2315_v48 = vpop.f32.mrf.mxu0 }
 0x1d6   : > { %1189 = vst [vmem:[%s2986_s11 + $0x28] sm:$0xff] %v3023_v16  ;;  %v1285_v10 = vmul.f32 %v1243_v14, %v3023_v16  ;;  %v2316_v1 = vadd.f32 %v2315_v48, %v2314_v0  ;;  %v1261_v0 = vpop.permute.xlu0 %1260  ;;  %v2518_v14 = vld [vmem:[%s3337_s7 + $0x78] sm:$0xff]  }
 0x1d7   : > { %v2317_v19 = vpop.f32.mrf.mxu0  ;;  %v2519_v48 = vld [vmem:[%s3337_s7 + $0x38] sm:$0xff]   ;;  %2344 = vmatprep.subr.bf16.mxu0 %v2518_v14 }
 0x1d8   : > { %v3030_v21 = vadd.f32 %v2316_v1, %v2979_v33  ;;  %1322 = vrot.lane.b32.xlu1 %v1285_v10, %s2575_s21  ;;  %v2520_v10 = vld [vmem:[%s3337_s7 + $0x70] sm:$0xff]   ;;  %2345 = vmatpush3.bf16.msra.mxu0 %v2519_v48 }
 0x1d9   : > { %v2318_v23 = vpop.f32.mrf.mxu0  ;;  %2346 = vmatprep.subr.bf16.mxu0 %v2520_v10 }
 0x1da   : > { %1190 = vst [vmem:[%s2986_s11 + $0x30] sm:$0xff] %v3030_v21  ;;  %v1286_v4 = vmul.f32 %v1245_v20, %v3030_v21  ;;  %v2319_v26 = vadd.f32 %v2318_v23, %v2317_v19 }
 0x1db   : > { %v2320_v11 = vpop.f32.mrf.mxu0 }
 0x1dc   : > { %v3037_v29 = vadd.f32 %v2319_v26, %v2979_v33  ;;  %1324 = vrot.lane.b32.xlu0 %v1286_v4, %s2575_s21  ;;  %v2521_v4 = vld [vmem:[%s3337_s7 + $0x30] sm:$0xff]   ;;  %v1263_v26 = vpop.permute.xlu1 %1262 }
 0x1dd   : > { %v2321_v32 = vpop.f32.mrf.mxu0  ;;  %2347 = vmatpush3.bf16.msra.mxu0 %v2521_v4 }
 0x1de   : > { %1191 = vst [vmem:[%s2986_s11 + $0x38] sm:$0xff] %v3037_v29  ;;  %v1287_v35 = vmul.f32 %v1247_v27, %v3037_v29  ;;  %v2322_v36 = vadd.f32 %v2321_v32, %v2320_v11  ;;  %v2522_v11 = vld [vmem:[%s3337_s7 + $0x68] sm:$0xff]  }
 0x1df   : > { %v2323_v37 = vpop.f32.mrf.mxu0  ;;  %2348 = vmatprep.subr.bf16.mxu0 %v2522_v11 }
 0x1e0   : > { %v3044_v39 = vadd.f32 %v2322_v36, %v2979_v33  ;;  %1326 = vrot.lane.b32.xlu1 %v1287_v35, %s2575_s21  ;;  %v2523_v35 = vld [vmem:[%s3337_s7 + $0x28] sm:$0xff]   ;;  %v2524_v36 = vld [vmem:[%s3337_s7 + $0x60] sm:$0xff]  }
 0x1e1   : > { %v2324_v41 = vpop.f32.mrf.mxu0  ;;  %2349 = vmatpush3.bf16.msra.mxu0 %v2523_v35 }
 0x1e2   : > { %1192 = vst [vmem:[%s2986_s11 + $0x40] sm:$0xff] %v3044_v39  ;;  %v1288_v17 = vmul.f32 %v1249_v38, %v3044_v39  ;;  %v2325_v42 = vadd.f32 %v2324_v41, %v2323_v37  ;;  %2350 = vmatprep.subr.bf16.mxu0 %v2524_v36  ;;  %v2526_v37 = vld [vmem:[%s3337_s7 + $0x58] sm:$0xff]   ;;  %v2528_v41 = vld [vmem:[%s3337_s7 + $0x50] sm:$0xff]  }
 0x1e3   : > { %v2326_v43 = vpop.f32.mrf.mxu0  ;;  %v2527_v38 = vld [vmem:[%s3337_s7 + $0x18] sm:$0xff]  }
 0x1e4   : > { %v3051_v24 = vadd.f32 %v2325_v42, %v2979_v33  ;;  %1328 = vrot.lane.b32.xlu0 %v1288_v17, %s2575_s21  ;;  %v2529_v17 = vld [vmem:[%s3337_s7 + $0x10] sm:$0xff]   ;;  %v2530_v42 = vld [vmem:[%s3337_s7 + $0x48] sm:$0xff]  }
 0x1e5   : > { %v2327_v30 = vpop.f32.mrf.mxu0 }
 0x1e6   : > { %1193 = vst [vmem:[%s2986_s11 + $0x48] sm:$0xff] %v3051_v24  ;;  %v1289_v18 = vmul.f32 %v1251_v44, %v3051_v24  ;;  %v2328_v45 = vadd.f32 %v2327_v30, %v2326_v43  ;;  %v2531_v43 = vld [vmem:[%s3337_s7 + $0x8] sm:$0xff]  }
 0x1e7   : > { %v2329_v46 = vpop.f32.mrf.mxu0 }
 0x1e8   : > { %v3058_v34 = vadd.f32 %v2328_v45, %v2979_v33  ;;  %1330 = vrot.lane.b32.xlu1 %v1289_v18, %s2575_s21 }
 0x1e9   : > { %v2330_v47 = vpop.f32.mrf.mxu0  ;;  %v825_v10 = vpop.f32.mrf.mxu1 }
 0x1ea   : > { %1194 = vst [vmem:[%s2986_s11 + $0x50] sm:$0xff] %v3058_v34  ;;  %v1290_v22 = vmul.f32 %v1253_v25, %v3058_v34  ;;  %v2331_v40 = vadd.f32 %v2330_v47, %v2329_v46 }
 0x1eb   : > { %v2332_v49 = vpop.f32.mrf.mxu0 }
 0x1ec   : > { %v3065_v50 = vadd.f32 %v2331_v40, %v2979_v33  ;;  %1332 = vrot.lane.b32.xlu0 %v1290_v22, %s2575_s21 }
 0x1ed   : > { %v2333_v51 = vpop.f32.mrf.mxu0 }
 0x1ee   : > { %1195 = vst [vmem:[%s2986_s11 + $0x58] sm:$0xff] %v3065_v50  ;;  %v1291_v52 = vmul.f32 %v1255_v6, %v3065_v50  ;;  %v2334_v53 = vadd.f32 %v2333_v51, %v2332_v49 }
 0x1ef   : > { %v2335_v55 = vpop.f32.mrf.mxu0 }
 0x1f0   : > { %v3072_v56 = vadd.f32 %v2334_v53, %v2979_v33  ;;  %1334 = vrot.lane.b32.xlu1 %v1291_v52, %s2575_s21 }
 0x1f1   : > { %v2336_v59 = vpop.f32.mrf.mxu0 }
 0x1f2   : > { %1196 = vst [vmem:[%s2986_s11 + $0x60] sm:$0xff] %v3072_v56  ;;  %v1292_v60 = vmul.f32 %v1257_v57, %v3072_v56  ;;  %v2337_v62 = vadd.f32 %v2336_v59, %v2335_v55 }
 0x1f3   : > { %v2338_v28 = vpop.f32.mrf.mxu0 }
 0x1f4   : > { %v3079_v5 = vadd.f32 %v2337_v62, %v2979_v33  ;;  %1336 = vrot.lane.b32.xlu0 %v1292_v60, %s2575_s21 }
 0x1f5   : > { %v2339_v7 = vpop.f32.mrf.mxu0 }
 0x1f6   : > { %1197 = vst [vmem:[%s2986_s11 + $0x68] sm:$0xff] %v3079_v5  ;;  %v1293_v9 = vmul.f32 %v1259_v3, %v3079_v5  ;;  %v2340_v12 = vadd.f32 %v2339_v7, %v2338_v28 }
 0x1f7   : > { %v2341_v13 = vpop.f32.mrf.mxu0 }
 0x1f8   : > { %v3095_v1 = vadd.f32 %v2340_v12, %v2979_v33  ;;  %1338 = vrot.lane.b32.xlu1 %v1293_v9, %s2575_s21 }
 0x1f9   : > { %v2342_v19 = vpop.f32.mrf.mxu0 }
 0x1fa   : > { %1198 = vst [vmem:[%s2986_s11 + $0x70] sm:$0xff] %v3095_v1  ;;  %v1294_v20 = vmul.f32 %v1261_v0, %v3095_v1  ;;  %v2343_v23 = vadd.f32 %v2342_v19, %v2341_v13  ;;  %v827_v19 = vpop.f32.mrf.mxu1 }
 0x1fc   : > { %v3108_v27 = vadd.f32 %v2343_v23, %v2979_v33  ;;  %1340 = vrot.lane.b32.xlu0 %v1294_v20, %s2575_s21  ;;  %v2525_v33 = vld [vmem:[%s3337_s7 + $0x20] sm:$0xff]   ;;  %v829_v20 = vpop.f32.mrf.mxu1 }
 0x1fd   : > { %2351 = vmatpush3.bf16.msra.mxu0 %v2525_v33 }
 0x1fe   : > { %1199 = vst [vmem:[%s2986_s11 + $0x78] sm:$0xff] %v3108_v27  ;;  %v1295_v32 = vmul.f32 %v1263_v26, %v3108_v27  ;;  %2352 = vmatprep.subr.bf16.mxu0 %v2526_v37 }
 0x200   : > { %1342 = vrot.lane.b32.xlu1 %v1295_v32, %s2575_s21 }
 0x201   : > { %2353 = vmatpush3.bf16.msra.mxu0 %v2527_v38 }
 0x202   : > { %2354 = vmatprep.subr.bf16.mxu0 %v2528_v41 }
 0x205   : > { %2355 = vmatpush3.bf16.msra.mxu0 %v2529_v17 }
 0x206   : > { %2356 = vmatprep.subr.bf16.mxu0 %v2530_v42 }
 0x209   : > { %2357 = vmatpush3.bf16.msra.mxu0 %v2531_v43 }
 0x236   : > { %v1313_v44 = vpop.permute.xlu0 %1312 }
 0x237   : > { %v1360_v18 = vadd.f32 %v1313_v44, %v2989_v31 }
 0x23a   : > { %v1315_v30 = vpop.permute.xlu1 %1314 }
 0x23b   : > { %v1361_v45 = vadd.f32 %v1315_v30, %v2995_v63 }
 0x23d   : > { %v1376_v46 = vpack.c.bf16 %v1361_v45, %v1360_v18 }
 0x23e   : > { %v1317_v25 = vpop.permute.xlu0 %1316 }
 0x23f   : > { %2174 = vmatmul.mubr.msk.bf16.vlgmr.msra.gmra.mxu1 %vm1432_vm0, %v1376_v46  ;;  %v1362_v22 = vadd.f32 %v1317_v25, %v3002_v54 }
 0x240   : > { %1499 = vmatprep.mubr.bf16.mxu1 %v2574_v2 }
 0x242   : > { %v1319_v47 = vpop.permute.xlu1 %1318 }
 0x243   : > { %v1363_v40 = vadd.f32 %v1319_v47, %v3009_v15 }
 0x245   : > { %v1377_v49 = vpack.c.bf16 %v1363_v40, %v1362_v22 }
 0x246   : > { %v1321_v6 = vpop.permute.xlu0 %1320 }
 0x247   : > { %2175 = vmatmul.mubr.msk.bf16.gmra.mxu1 %vm1432_vm0, %v1377_v49  ;;  %v1364_v63 = vadd.f32 %v1321_v6, %v3016_v8  ;;  %v460_v6 = vsub.s32 2, %v2826_v58 }
 0x248   : > { %1509 = vmatprep.mubr.bf16.mxu1 %v2574_v2 }
 0x24a   : > { %v1323_v31 = vpop.permute.xlu1 %1322 }
 0x24b   : > { %v1365_v51 = vadd.f32 %v1323_v31, %v3023_v16 }
 0x24d   : > { %v1378_v52 = vpack.c.bf16 %v1365_v51, %v1364_v63  ;;  %v464_v63 = vsub.s32 3, %v2826_v58  ;;  %v3228_v51 = vrot.slane %v2833_v61, %v460_v6 }
 0x24e   : > { %v1325_v53 = vpop.permute.xlu0 %1324 }
 0x24f   : > { %2176 = vmatmul.mubr.msk.bf16.gmra.mxu1 %vm1432_vm0, %v1378_v52  ;;  %v1366_v15 = vadd.f32 %v1325_v53, %v3030_v21  ;;  %v3233_v53 = vrot.slane %v2833_v61, %v464_v63 }
 0x250   : > { %1519 = vmatprep.mubr.bf16.mxu1 %v2574_v2 }
 0x252   : > { %v1327_v54 = vpop.permute.xlu1 %1326 }
 0x253   : > { %v1367_v55 = vadd.f32 %v1327_v54, %v3037_v29 }
 0x255   : > { %v1379_v57 = vpack.c.bf16 %v1367_v55, %v1366_v15  ;;  %v826_v15 = vadd.f32 %v825_v10, %v3228_v51 }
 0x256   : > { %v1329_v59 = vpop.permute.xlu0 %1328 }
 0x257   : > { %2177 = vmatmul.mubr.msk.bf16.gmra.mxu1 %vm1432_vm0, %v1379_v57  ;;  %v1368_v16 = vadd.f32 %v1329_v59, %v3044_v39  ;;  %v828_v57 = vadd.f32 %v827_v19, %v3233_v53  ;;  %v830_v59 = vadd.f32 %v829_v20, %v3228_v51 }
 0x258   : > { %1529 = vmatprep.mubr.bf16.mxu1 %v2574_v2 }
 0x25a   : > { %v1331_v8 = vpop.permute.xlu1 %1330 }
 0x25b   : > { %v1369_v60 = vadd.f32 %v1331_v8, %v3051_v24 }
 0x25d   : > { %v1380_v62 = vpack.c.bf16 %v1369_v60, %v1368_v16 }
 0x25e   : > { %v1333_v28 = vpop.permute.xlu0 %1332 }
 0x25f   : > { %2178 = vmatmul.mubr.msk.bf16.gmra.mxu1 %vm1432_vm0, %v1380_v62  ;;  %v1370_v29 = vadd.f32 %v1333_v28, %v3058_v34 }
 0x260   : > { %1539 = vmatprep.mubr.bf16.mxu1 %v2574_v2 }
 0x262   : > { %v1335_v21 = vpop.permute.xlu1 %1334 }
 0x263   : > { %v1371_v3 = vadd.f32 %v1335_v21, %v3065_v50 }
 0x265   : > { %v1381_v7 = vpack.c.bf16 %v1371_v3, %v1370_v29 }
 0x266   : > { %v1337_v9 = vpop.permute.xlu0 %1336 }
 0x267   : > { %2179 = vmatmul.mubr.msk.bf16.gmra.mxu1 %vm1432_vm0, %v1381_v7  ;;  %v1372_v24 = vadd.f32 %v1337_v9, %v3072_v56  ;;  %v2532_v56 = vld [vmem:[%s3337_s7 + $0x40] sm:$0xff]  }
 0x268   : > { %1549 = vmatprep.mubr.bf16.mxu1 %v2574_v2  ;;  %2358 = vmatprep.subr.bf16.mxu0 %v2532_v56 }
 0x26a   : > { %v1339_v39 = vpop.permute.xlu1 %1338 }
 0x26b   : > { %v1373_v12 = vadd.f32 %v1339_v39, %v3079_v5  ;;  %v2533_v5 = vld [vmem:[%s3337_s7] sm:$0xff]  }
 0x26c   : > { %2359 = vmatpush3.bf16.msra.mxu0 %v2533_v5 }
 0x26d   : > { %v1382_v13 = vpack.c.bf16 %v1373_v12, %v1372_v24 }
 0x26e   : > { %v1341_v0 = vpop.permute.xlu0 %1340 }
 0x26f   : > { %2180 = vmatmul.mubr.msk.bf16.gmra.mxu1 %vm1432_vm0, %v1382_v13  ;;  %v1374_v50 = vadd.f32 %v1341_v0, %v3095_v1 }
 0x270   : > { %1559 = vmatprep.mubr.bf16.mxu1 %v2574_v2  ;;  %v831_v2 = vpop.f32.mrf.mxu1 }
 0x271   : > { %v832_v58 = vadd.f32 %v831_v2, %v3233_v53 }
 0x272   : > { %v1343_v34 = vpop.permute.xlu1 %1342  ;;  %v835_v1 = vpop.f32.mrf.mxu1 }
 0x273   : > { %v1375_v14 = vadd.f32 %v1343_v34, %v3108_v27  ;;  %v836_v7 = vadd.f32 %v835_v1, %v3228_v51 }
 0x274   : > { %v837_v23 = vpop.f32.mrf.mxu1 }
 0x275   : > { %v1383_v48 = vpack.c.bf16 %v1375_v14, %v1374_v50  ;;  %v838_v13 = vadd.f32 %v837_v23, %v3233_v53 }
 0x276   : > { %v839_v4 = vpop.f32.mrf.mxu1 }
 0x277   : > { %2181 = vmatmul.mubr.msk.bf16.gmra.mxu1 %vm1432_vm0, %v1383_v48  ;;  %v840_v0 = vadd.f32 %v839_v4, %v3228_v51 }
 0x278   : > { %v841_v26 = vpop.f32.mrf.mxu1 }
 0x279   : > { %v842_v48 = vadd.f32 %v841_v26, %v3233_v53 }
 0x27a   : > { %v3179_v11 = vpop.f32.mrf.mxu1 }
 0x27b   : > { %v846_v6 = vadd.f32 %v3179_v11, %v3228_v51 }
 0x27c   : > { %v3181_v27 = vpop.f32.mrf.mxu1 }
 0x27e   : > { %v3183_v32 = vpop.f32.mrf.mxu1 }
 0x27f   : > { %v850_v26 = vadd.f32 %v3183_v32, %v3228_v51 }
 0x280   : > { %v3185_v35 = vpop.f32.mrf.mxu1 }
 0x282   : > { %v3187_v36 = vpop.f32.mrf.mxu1 }
 0x284   : > { %v3189_v33 = vpop.f32.mrf.mxu1 }
 0x286   : > { %v3191_v37 = vpop.f32.mrf.mxu1 }
 0x288   : > { %v3193_v38 = vpop.f32.mrf.mxu1 }
 0x28a   : > { %v3195_v41 = vpop.f32.mrf.mxu1 }
 0x28c   : > { %v3197_v17 = vpop.f32.mrf.mxu1 }
 0x28e   : > { %v3199_v42 = vpop.f32.mrf.mxu1 }
 0x290   : > { %v3201_v43 = vpop.f32.mrf.mxu1 }
 0x292   : > { %v3203_v44 = vpop.f32.mrf.mxu1 }
 0x294   : > { %v3205_v30 = vpop.f32.mrf.mxu1 }
 0x296   : > { %v3207_v18 = vpop.f32.mrf.mxu1 }
 0x298   : > { %v3209_v45 = vpop.f32.mrf.mxu1 }
 0x29a   : > { %v3211_v46 = vpop.f32.mrf.mxu1 }
 0x29c   : > { %v3213_v25 = vpop.f32.mrf.mxu1 }
 0x29e   : > { %v3215_v47 = vpop.f32.mrf.mxu1 }
 0x2a0   : > { %v3217_v22 = vpop.f32.mrf.mxu1 }
 0x2a2   : > { %v3219_v40 = vpop.f32.mrf.mxu1 }
 0x2a4   : > { %v3221_v49 = vpop.f32.mrf.mxu1 }
 0x2a6   : > { %v3224_v31 = vpop.f32.mrf.mxu1 }
 0x2a8   : > { %v3230_v52 = vpop.f32.mrf.mxu1 }
 0x2ff   : > { %v1491_v54 = vpop.f32.mrf.mxu1 }
 0x300   : > { %v1492_v8 = vadd.f32 %v1491_v54, %v826_v15  ;;  %v848_v15 = vadd.f32 %v3181_v27, %v3233_v53  ;;  %v856_v27 = vadd.f32 %v3187_v36, %v3228_v51 }
 0x301   : > { %v1493_v55 = vpop.f32.mrf.mxu1 }
 0x302   : > { %v1494_v60 = vadd.f32 %v1493_v55, %v828_v57  ;;  %v1570_v21 = vmax.f32 %v1492_v8, 0.0  ;;  %v852_v8 = vadd.f32 %v3185_v35, %v3233_v53  ;;  %v860_v35 = vadd.f32 %v3191_v37, %v3228_v51 }
 0x303   : > { %v1495_v16 = vpop.f32.mrf.mxu1 }
 0x304   : > { %v1496_v62 = vadd.f32 %v1495_v16, %v830_v59  ;;  %v1571_v9 = vmax.f32 %v1494_v60, 0.0 }
 0x305   : > { %v1497_v28 = vpop.f32.mrf.mxu1 }
 0x306   : > { %v1572_v29 = vmax.f32 %v1496_v62, 0.0  ;;  %v1498_v3 = vadd.f32 %v1497_v28, %v832_v58 }
 0x307   : > { %v1501_v61 = vpop.f32.mrf.mxu1 }
 0x308   : > { %v1602_v39 = vpack.c.bf16 %v1572_v29, %v1570_v21  ;;  %v1573_v24 = vmax.f32 %v1498_v3, 0.0  ;;  %v1502_v50 = vadd.f32 %v1501_v61, %v836_v7  ;;  %v858_v7 = vadd.f32 %v3189_v33, %v3233_v53 }
 0x309   : > { %v1503_v12 = vpop.f32.mrf.mxu1  ;;  %v866_v33 = vadd.f32 %v3195_v41, %v3228_v51 }
 0x30a   : > { %v1603_v34 = vpack.c.bf16 %v1573_v24, %v1571_v9  ;;  %v1504_v10 = vadd.f32 %v1503_v12, %v838_v13  ;;  %v1574_v5 = vmax.f32 %v1502_v50, 0.0  ;;  %v862_v12 = vadd.f32 %v3193_v38, %v3233_v53 }
 0x30b   : > { %v1505_v14 = vpop.f32.mrf.mxu1  ;;  %v870_v38 = vadd.f32 %v3199_v42, %v3228_v51 }
 0x30c   : > { %v1506_v19 = vadd.f32 %v1505_v14, %v840_v0  ;;  %1785 = vmatprep.mubr.bf16.mxu0 %v1603_v34  ;;  %v1575_v23 = vmax.f32 %v1504_v10, 0.0 }
 0x30d   : > { %v1507_v56 = vpop.f32.mrf.mxu1  ;;  %1786 = vmatmul.mubr.bf16.vlgmr.msra.gmra.mxu0 %v1602_v39 }
 0x30e   : > { %v1576_v20 = vmax.f32 %v1506_v19, 0.0  ;;  %v1508_v2 = vadd.f32 %v1507_v56, %v842_v48 }
 0x30f   : > { %v1511_v1 = vpop.f32.mrf.mxu1 }
 0x310   : > { %v1604_v63 = vpack.c.bf16 %v1576_v20, %v1574_v5  ;;  %v1577_v4 = vmax.f32 %v1508_v2, 0.0  ;;  %v1512_v57 = vadd.f32 %v1511_v1, %v846_v6  ;;  %v868_v5 = vadd.f32 %v3197_v17, %v3233_v53 }
 0x311   : > { %v1513_v54 = vpop.f32.mrf.mxu1  ;;  %v872_v6 = vadd.f32 %v3201_v43, %v3233_v53  ;;  %v876_v17 = vadd.f32 %v3203_v44, %v3228_v51  ;;  %v880_v43 = vadd.f32 %v3207_v18, %v3228_v51 }
 0x312   : > { %v1605_v55 = vpack.c.bf16 %v1577_v4, %v1575_v23  ;;  %v1514_v16 = vadd.f32 %v1513_v54, %v848_v15  ;;  %v1578_v60 = vmax.f32 %v1512_v57, 0.0 }
 0x313   : > { %v1515_v59 = vpop.f32.mrf.mxu1 }
 0x314   : > { %v1516_v58 = vadd.f32 %v1515_v59, %v850_v26  ;;  %1793 = vmatprep.mubr.bf16.mxu0 %v1605_v55  ;;  %v1579_v29 = vmax.f32 %v1514_v16, 0.0 }
 0x315   : > { %v1517_v11 = vpop.f32.mrf.mxu1  ;;  %1794 = vmatmul.mubr.bf16.gmra.mxu0 %v1604_v63 }
 0x316   : > { %v1580_v62 = vmax.f32 %v1516_v58, 0.0  ;;  %v1518_v28 = vadd.f32 %v1517_v11, %v852_v8  ;;  %v878_v8 = vadd.f32 %v3205_v30, %v3233_v53  ;;  %v886_v30 = vadd.f32 %v3211_v46, %v3228_v51 }
 0x317   : > { %v1521_v21 = vpop.f32.mrf.mxu1 }
 0x318   : > { %v1606_v32 = vpack.c.bf16 %v1580_v62, %v1578_v60  ;;  %v1581_v3 = vmax.f32 %v1518_v28, 0.0  ;;  %v1522_v39 = vadd.f32 %v1521_v21, %v856_v27  ;;  %v882_v60 = vadd.f32 %v3209_v45, %v3233_v53 }
 0x319   : > { %v1523_v61 = vpop.f32.mrf.mxu1  ;;  %v890_v45 = vadd.f32 %v3215_v47, %v3228_v51 }
 0x31a   : > { %v1607_v9 = vpack.c.bf16 %v1581_v3, %v1579_v29  ;;  %v1524_v13 = vadd.f32 %v1523_v61, %v858_v7  ;;  %v1582_v34 = vmax.f32 %v1522_v39, 0.0 }
 0x31b   : > { %v1525_v24 = vpop.f32.mrf.mxu1 }
 0x31c   : > { %v1526_v0 = vadd.f32 %v1525_v24, %v860_v35  ;;  %1801 = vmatprep.mubr.bf16.mxu0 %v1607_v9  ;;  %v1583_v10 = vmax.f32 %v1524_v13, 0.0  ;;  %v888_v35 = vadd.f32 %v3213_v25, %v3233_v53  ;;  %v896_v25 = vadd.f32 %v3219_v40, %v3228_v51 }
 0x31d   : > { %v1527_v36 = vpop.f32.mrf.mxu1  ;;  %1802 = vmatmul.mubr.bf16.gmra.mxu0 %v1606_v32 }
 0x31e   : > { %v1584_v50 = vmax.f32 %v1526_v0, 0.0  ;;  %v1528_v14 = vadd.f32 %v1527_v36, %v862_v12  ;;  %v892_v12 = vadd.f32 %v3217_v22, %v3233_v53  ;;  %v900_v22 = vadd.f32 %v3224_v31, %v3228_v51  ;;  %v3294_v51 = vld [vmem:[%s3338_s8] ss:$0 sm:$0xff] }
 0x31f   : > { %v1531_v48 = vpop.f32.mrf.mxu1 }
 0x320   : > { %v1608_v37 = vpack.c.bf16 %v1584_v50, %v1582_v34  ;;  %v1585_v19 = vmax.f32 %v1528_v14, 0.0  ;;  %v1532_v2 = vadd.f32 %v1531_v48, %v866_v33 }
 0x321   : > { %v1533_v56 = vpop.f32.mrf.mxu1 }
 0x322   : > { %v1609_v20 = vpack.c.bf16 %v1585_v19, %v1583_v10  ;;  %v1534_v23 = vadd.f32 %v1533_v56, %v868_v5  ;;  %v1586_v4 = vmax.f32 %v1532_v2, 0.0 }
 0x323   : > { %v1535_v1 = vpop.f32.mrf.mxu1 }
 0x324   : > { %v1536_v63 = vadd.f32 %v1535_v1, %v870_v38  ;;  %1809 = vmatprep.mubr.bf16.mxu0 %v1609_v20  ;;  %v1587_v55 = vmax.f32 %v1534_v23, 0.0  ;;  %v902_v38 = vadd.f32 %v3230_v52, %v3233_v53 }
 0x325   : > { %v1537_v41 = vpop.f32.mrf.mxu1  ;;  %1810 = vmatmul.mubr.bf16.gmra.mxu0 %v1608_v37  ;;  %v898_v37 = vadd.f32 %v3221_v49, %v3233_v53 }
 0x326   : > { %v1588_v54 = vmax.f32 %v1536_v63, 0.0  ;;  %v1538_v15 = vadd.f32 %v1537_v41, %v872_v6 }
 0x327   : > { %v1541_v26 = vpop.f32.mrf.mxu1 }
 0x328   : > { %v1610_v42 = vpack.c.bf16 %v1588_v54, %v1586_v4  ;;  %v1589_v57 = vmax.f32 %v1538_v15, 0.0  ;;  %v1542_v58 = vadd.f32 %v1541_v26, %v876_v17 }
 0x329   : > { %v1543_v59 = vpop.f32.mrf.mxu1 }
 0x32a   : > { %v1611_v16 = vpack.c.bf16 %v1589_v57, %v1587_v55  ;;  %v1544_v62 = vadd.f32 %v1543_v59, %v878_v8  ;;  %v1590_v21 = vmax.f32 %v1542_v58, 0.0 }
 0x32b   : > { %v1545_v11 = vpop.f32.mrf.mxu1 }
 0x32c   : > { %v1546_v28 = vadd.f32 %v1545_v11, %v880_v43  ;;  %1817 = vmatprep.mubr.bf16.mxu0 %v1611_v16  ;;  %v1591_v3 = vmax.f32 %v1544_v62, 0.0 }
 0x32d   : > { %v1547_v44 = vpop.f32.mrf.mxu1  ;;  %1818 = vmatmul.mubr.bf16.gmra.mxu0 %v1610_v42 }
 0x32e   : > { %v1592_v27 = vmax.f32 %v1546_v28, 0.0  ;;  %v1548_v29 = vadd.f32 %v1547_v44, %v882_v60 }
 0x32f   : > { %v1551_v32 = vpop.f32.mrf.mxu1 }
 0x330   : > { %v1612_v18 = vpack.c.bf16 %v1592_v27, %v1590_v21  ;;  %v1593_v61 = vmax.f32 %v1548_v29, 0.0  ;;  %v1552_v39 = vadd.f32 %v1551_v32, %v886_v30 }
 0x331   : > { %v1553_v7 = vpop.f32.mrf.mxu1 }
 0x332   : > { %v1613_v9 = vpack.c.bf16 %v1593_v61, %v1591_v3  ;;  %v1554_v13 = vadd.f32 %v1553_v7, %v888_v35  ;;  %v1594_v36 = vmax.f32 %v1552_v39, 0.0 }
 0x333   : > { %v1555_v24 = vpop.f32.mrf.mxu1 }
 0x334   : > { %v1556_v0 = vadd.f32 %v1555_v24, %v890_v45  ;;  %1825 = vmatprep.mubr.bf16.mxu0 %v1613_v9  ;;  %v1595_v48 = vmax.f32 %v1554_v13, 0.0 }
 0x335   : > { %v1557_v46 = vpop.f32.mrf.mxu1  ;;  %1826 = vmatmul.mubr.bf16.gmra.mxu0 %v1612_v18 }
 0x336   : > { %v1596_v34 = vmax.f32 %v1556_v0, 0.0  ;;  %v1558_v50 = vadd.f32 %v1557_v46, %v892_v12 }
 0x337   : > { %v1561_v14 = vpop.f32.mrf.mxu1 }
 0x338   : > { %v1614_v47 = vpack.c.bf16 %v1596_v34, %v1594_v36  ;;  %v1597_v33 = vmax.f32 %v1558_v50, 0.0  ;;  %v1562_v56 = vadd.f32 %v1561_v14, %v896_v25 }
 0x339   : > { %v1563_v10 = vpop.f32.mrf.mxu1 }
 0x33a   : > { %v1615_v19 = vpack.c.bf16 %v1597_v33, %v1595_v48  ;;  %v1564_v20 = vadd.f32 %v1563_v10, %v898_v37  ;;  %v1598_v1 = vmax.f32 %v1562_v56, 0.0 }
 0x33b   : > { %v1565_v5 = vpop.f32.mrf.mxu1 }
 0x33c   : > { %v1566_v2 = vadd.f32 %v1565_v5, %v900_v22  ;;  %1833 = vmatprep.mubr.bf16.mxu0 %v1615_v19  ;;  %v1599_v63 = vmax.f32 %v1564_v20, 0.0 }
 0x33d   : > { %v1567_v40 = vpop.f32.mrf.mxu1  ;;  %1834 = vmatmul.mubr.bf16.gmra.mxu0 %v1614_v47 }
 0x33e   : > { %v1600_v6 = vmax.f32 %v1566_v2, 0.0  ;;  %v1568_v23 = vadd.f32 %v1567_v40, %v902_v38 }
 0x340   : > { %v1616_v41 = vpack.c.bf16 %v1600_v6, %v1598_v1  ;;  %v1601_v49 = vmax.f32 %v1568_v23, 0.0 }
 0x342   : > { %v1617_v4 = vpack.c.bf16 %v1601_v49, %v1599_v63 }
 0x344   : > { %1841 = vmatprep.mubr.bf16.mxu0 %v1617_v4 }
 0x345   : > { %1842 = vmatmul.mubr.bf16.gmra.mxu0 %v1616_v41 }
 0x3cd   : > { %v2360_v31 = vpop.f32.mrf.mxu0 }
 0x3cf   : > { %v2361_v52 = vpop.f32.mrf.mxu0 }
 0x3d0   : > { %v2362_v53 = vadd.f32 %v2361_v52, %v2360_v31 }
 0x3d1   : > { %v2363_v54 = vpop.f32.mrf.mxu0 }
 0x3d2   : > { %v1788_v15 = vadd.f32 %v2362_v53, %v3294_v51 }
 0x3d3   : > { %v2364_v26 = vpop.f32.mrf.mxu0 }
 0x3d4   : > { %v1850_v17 = vmul.f32 0.5, %v1788_v15  ;;  %v2365_v55 = vadd.f32 %v2364_v26, %v2363_v54 }
 0x3d5   : > { %v2366_v42 = vpop.f32.mrf.mxu0 }
 0x3d6   : > { %2534 = vtanh.f32 %v1850_v17  ;;  %v1791_v57 = vadd.f32 %v2365_v55, %v3294_v51 }
 0x3d7   : > { %v2367_v59 = vpop.f32.mrf.mxu0 }
 0x3d8   : > { %v1851_v8 = vmul.f32 0.5, %v1791_v57  ;;  %v2368_v43 = vadd.f32 %v2367_v59, %v2366_v42 }
 0x3d9   : > { %v2369_v16 = vpop.f32.mrf.mxu0 }
 0x3da   : > { %2536 = vtanh.f32 %v1851_v8  ;;  %v1796_v58 = vadd.f32 %v2368_v43, %v3294_v51 }
 0x3db   : > { %v2370_v11 = vpop.f32.mrf.mxu0 }
 0x3dc   : > { %v1852_v60 = vmul.f32 0.5, %v1796_v58  ;;  %v2371_v62 = vadd.f32 %v2370_v11, %v2369_v16 }
 0x3dd   : > { %v2372_v28 = vpop.f32.mrf.mxu0 }
 0x3de   : > { %2538 = vtanh.f32 %v1852_v60  ;;  %v1799_v44 = vadd.f32 %v2371_v62, %v3294_v51 }
 0x3df   : > { %v2373_v21 = vpop.f32.mrf.mxu0 }
 0x3e0   : > { %v1853_v27 = vmul.f32 0.5, %v1799_v44  ;;  %v2374_v29 = vadd.f32 %v2373_v21, %v2372_v28 }
 0x3e1   : > { %v2375_v32 = vpop.f32.mrf.mxu0 }
 0x3e2   : > { %2540 = vtanh.f32 %v1853_v27  ;;  %v1804_v30 = vadd.f32 %v2374_v29, %v3294_v51 }
 0x3e3   : > { %v2535_v3 = vpop.eup %2534  ;;  %v2376_v18 = vpop.f32.mrf.mxu0 }
 0x3e4   : > { %v1854_v61 = vmul.f32 0.5, %v1804_v30  ;;  %v2377_v7 = vadd.f32 %v2376_v18, %v2375_v32  ;;  %v1882_v45 = vmul.f32 0.5, %v2535_v3 }
 0x3e5   : > { %v2378_v35 = vpop.f32.mrf.mxu0 }
 0x3e6   : > { %2542 = vtanh.f32 %v1854_v61  ;;  %v1807_v9 = vadd.f32 %v2377_v7, %v3294_v51  ;;  %v1898_v36 = vadd.f32 0.5, %v1882_v45 }
 0x3e7   : > { %v2537_v39 = vpop.eup %2536  ;;  %v2379_v24 = vpop.f32.mrf.mxu0 }
 0x3e8   : > { %v1883_v12 = vmul.f32 0.5, %v2537_v39  ;;  %v1855_v13 = vmul.f32 0.5, %v1807_v9  ;;  %v2380_v0 = vadd.f32 %v2379_v24, %v2378_v35 }
 0x3e9   : > { %v2381_v46 = vpop.f32.mrf.mxu0 }
 0x3ea   : > { %v1899_v34 = vadd.f32 0.5, %v1883_v12  ;;  %2544 = vtanh.f32 %v1855_v13  ;;  %v1812_v50 = vadd.f32 %v2380_v0, %v3294_v51 }
 0x3eb   : > { %v2539_v14 = vpop.eup %2538  ;;  %v2382_v25 = vpop.f32.mrf.mxu0 }
 0x3ec   : > { %v2236_v48 = vpack.c.bf16 %v1899_v34, %v1898_v36  ;;  %v1856_v47 = vmul.f32 0.5, %v1812_v50  ;;  %v2383_v33 = vadd.f32 %v2382_v25, %v2381_v46  ;;  %v1884_v37 = vmul.f32 0.5, %v2539_v14 }
 0x3ed   : > { %v2384_v10 = vpop.f32.mrf.mxu0 }
 0x3ee   : > { %2237 = vst [vmem:[%s3308_s18] sm:$0xff] %v2236_v48   ;;  %2546 = vtanh.f32 %v1856_v47  ;;  %v1815_v22 = vadd.f32 %v2383_v33, %v3294_v51  ;;  %v1900_v40 = vadd.f32 0.5, %v1884_v37 }
 0x3ef   : > { %v2541_v19 = vpop.eup %2540  ;;  %v2385_v56 = vpop.f32.mrf.mxu0 }
 0x3f0   : > { %v1885_v5 = vmul.f32 0.5, %v2541_v19  ;;  %v1857_v38 = vmul.f32 0.5, %v1815_v22  ;;  %v2386_v20 = vadd.f32 %v2385_v56, %v2384_v10 }
 0x3f1   : > { %v2387_v2 = vpop.f32.mrf.mxu0 }
 0x3f2   : > { %v1901_v1 = vadd.f32 0.5, %v1885_v5  ;;  %2548 = vtanh.f32 %v1857_v38  ;;  %v1820_v6 = vadd.f32 %v2386_v20, %v3294_v51 }
 0x3f3   : > { %v2543_v23 = vpop.eup %2542  ;;  %v2388_v63 = vpop.f32.mrf.mxu0 }
 0x3f4   : > { %v2241_v41 = vpack.c.bf16 %v1901_v1, %v1900_v40  ;;  %v1858_v49 = vmul.f32 0.5, %v1820_v6  ;;  %v2389_v4 = vadd.f32 %v2388_v63, %v2387_v2  ;;  %v1886_v52 = vmul.f32 0.5, %v2543_v23 }
 0x3f5   : > { %v2390_v31 = vpop.f32.mrf.mxu0 }
 0x3f6   : > { %2273 = vst [vmem:[%s3308_s18 + $0x8] sm:$0xff] %v2241_v41   ;;  %2550 = vtanh.f32 %v1858_v49  ;;  %v1823_v53 = vadd.f32 %v2389_v4, %v3294_v51  ;;  %v1902_v57 = vadd.f32 0.5, %v1886_v52 }
 0x3f7   : > { %v2545_v54 = vpop.eup %2544  ;;  %v2391_v15 = vpop.f32.mrf.mxu0 }
 0x3f8   : > { %v1887_v26 = vmul.f32 0.5, %v2545_v54  ;;  %v1859_v17 = vmul.f32 0.5, %v1823_v53  ;;  %v2392_v55 = vadd.f32 %v2391_v15, %v2390_v31 }
 0x3f9   : > { %v2393_v42 = vpop.f32.mrf.mxu0 }
 0x3fa   : > { %v1903_v59 = vadd.f32 0.5, %v1887_v26  ;;  %2552 = vtanh.f32 %v1859_v17  ;;  %v1828_v8 = vadd.f32 %v2392_v55, %v3294_v51 }
 0x3fb   : > { %v2547_v43 = vpop.eup %2546  ;;  %v2394_v16 = vpop.f32.mrf.mxu0 }
 0x3fc   : > { %v2246_v58 = vpack.c.bf16 %v1903_v59, %v1902_v57  ;;  %v1860_v11 = vmul.f32 0.5, %v1828_v8  ;;  %v2395_v60 = vadd.f32 %v2394_v16, %v2393_v42  ;;  %v1888_v28 = vmul.f32 0.5, %v2547_v43 }
 0x3fd   : > { %v2396_v62 = vpop.f32.mrf.mxu0 }
 0x3fe   : > { %2274 = vst [vmem:[%s3308_s18 + $0x10] sm:$0xff] %v2246_v58   ;;  %2554 = vtanh.f32 %v1860_v11  ;;  %v1831_v44 = vadd.f32 %v2395_v60, %v3294_v51  ;;  %v1904_v18 = vadd.f32 0.5, %v1888_v28 }
 0x3ff   : > { %v2549_v21 = vpop.eup %2548  ;;  %v2397_v27 = vpop.f32.mrf.mxu0 }
 0x400   : > { %v1889_v29 = vmul.f32 0.5, %v2549_v21  ;;  %v1861_v32 = vmul.f32 0.5, %v1831_v44  ;;  %v2398_v30 = vadd.f32 %v2397_v27, %v2396_v62 }
 0x401   : > { %v2399_v3 = vpop.f32.mrf.mxu0 }
 0x402   : > { %v1905_v61 = vadd.f32 0.5, %v1889_v29  ;;  %2556 = vtanh.f32 %v1861_v32  ;;  %v1836_v7 = vadd.f32 %v2398_v30, %v3294_v51 }
 0x403   : > { %v2551_v35 = vpop.eup %2550  ;;  %v2400_v45 = vpop.f32.mrf.mxu0 }
 0x404   : > { %v2251_v9 = vpack.c.bf16 %v1905_v61, %v1904_v18  ;;  %v1862_v39 = vmul.f32 0.5, %v1836_v7  ;;  %v2401_v24 = vadd.f32 %v2400_v45, %v2399_v3  ;;  %v1890_v13 = vmul.f32 0.5, %v2551_v35 }
 0x405   : > { %v2402_v12 = vpop.f32.mrf.mxu0 }
 0x406   : > { %2275 = vst [vmem:[%s3308_s18 + $0x18] sm:$0xff] %v2251_v9   ;;  %2558 = vtanh.f32 %v1862_v39  ;;  %v1839_v0 = vadd.f32 %v2401_v24, %v3294_v51  ;;  %v1906_v48 = vadd.f32 0.5, %v1890_v13 }
 0x407   : > { %v2553_v46 = vpop.eup %2552  ;;  %v2403_v36 = vpop.f32.mrf.mxu0 }
 0x408   : > { %v1891_v34 = vmul.f32 0.5, %v2553_v46  ;;  %v1863_v50 = vmul.f32 0.5, %v1839_v0  ;;  %v2404_v14 = vadd.f32 %v2403_v36, %v2402_v12 }
 0x409   : > { %v2405_v25 = vpop.f32.mrf.mxu0 }
 0x40a   : > { %v1907_v47 = vadd.f32 0.5, %v1891_v34  ;;  %2560 = vtanh.f32 %v1863_v50  ;;  %v1844_v33 = vadd.f32 %v2404_v14, %v3294_v51 }
 0x40b   : > { %v2555_v10 = vpop.eup %2554  ;;  %v2406_v37 = vpop.f32.mrf.mxu0 }
 0x40c   : > { %v2256_v22 = vpack.c.bf16 %v1907_v47, %v1906_v48  ;;  %v1864_v19 = vmul.f32 0.5, %v1844_v33  ;;  %v2407_v56 = vadd.f32 %v2406_v37, %v2405_v25  ;;  %v1892_v5 = vmul.f32 0.5, %v2555_v10 }
 0x40e   : > { %2276 = vst [vmem:[%s3308_s18 + $0x20] sm:$0xff] %v2256_v22   ;;  %2562 = vtanh.f32 %v1864_v19  ;;  %v1847_v38 = vadd.f32 %v2407_v56, %v3294_v51  ;;  %v1908_v1 = vadd.f32 0.5, %v1892_v5 }
 0x40f   : > { %v2557_v20 = vpop.eup %2556 }
 0x410   : > { %v1893_v2 = vmul.f32 0.5, %v2557_v20  ;;  %v1865_v40 = vmul.f32 0.5, %v1847_v38 }
 0x412   : > { %v1909_v6 = vadd.f32 0.5, %v1893_v2  ;;  %2564 = vtanh.f32 %v1865_v40 }
 0x413   : > { %v2559_v23 = vpop.eup %2558 }
 0x414   : > { %v2261_v63 = vpack.c.bf16 %v1909_v6, %v1908_v1  ;;  %v1894_v41 = vmul.f32 0.5, %v2559_v23 }
 0x416   : > { %2277 = vst [vmem:[%s3308_s18 + $0x28] sm:$0xff] %v2261_v63   ;;  %v1910_v31 = vadd.f32 0.5, %v1894_v41 }
 0x417   : > { %v2561_v49 = vpop.eup %2560 }
 0x418   : > { %v1895_v4 = vmul.f32 0.5, %v2561_v49 }
 0x41a   : > { %v1911_v52 = vadd.f32 0.5, %v1895_v4 }
 0x41b   : > { %v2563_v53 = vpop.eup %2562 }
 0x41c   : > { %v2266_v54 = vpack.c.bf16 %v1911_v52, %v1910_v31  ;;  %v1896_v51 = vmul.f32 0.5, %v2563_v53 }
 0x41e   : > { %2278 = vst [vmem:[%s3308_s18 + $0x30] sm:$0xff] %v2266_v54   ;;  %v1912_v17 = vadd.f32 0.5, %v1896_v51 }
 0x41f   : > { %v2565_v15 = vpop.eup %2564 }
 0x420   : > { %v1897_v26 = vmul.f32 0.5, %v2565_v15 }
 0x422   : > { %v1913_v55 = vadd.f32 0.5, %v1897_v26 }
 0x424   : > { %v2271_v42 = vpack.c.bf16 %v1913_v55, %v1912_v17 }
 0x426   : > { %2279 = vst [vmem:[%s3308_s18 + $0x38] sm:$0xff] %v2271_v42  }
 0x427 PF: > { %s21_s13 = sadd.s32 1, %s2572_s13  }
 0x428   : > { %p18_p4 = scmp.ge.s32.totalorder %s21_s13, 4  }
 0x42a   :  { %20 = sbr.rel (!%p18_p4) target bundleno = 1 (0x1), region = 101 }

</bundles_post_ra>
